<compile_context>
chip_gen: v7x
topology: tpu7x:2x2x1
jax: 0.10.0
libtpu: 0.0.40
codegen_flags: <defaults>
</compile_context>

<pallas_src>
import jax
import jax.numpy as jnp
from jax.experimental import pallas as pl
from jax.experimental.pallas import tpu as pltpu


def _pad_to(n, m):
    return -(-n // m) * m


# ------------------------------- Pallas kernel ------------------------------ #

def _late_fusion_kernel(x_img_ref, x_cap_ref, w1i_ref, w1c_ref, w2_ref,
                        w345_ref, b_ref, o_ref):
    """Both late_fusion_mlp branches (BN/bias pre-folded) + elementwise sum."""

    def branch(x_ref, w1_ref, w2_slot, w345_base, b_base):
        # Layer 1: Linear(+folded BN) -> ReLU.   (Bp, Kin) @ (Kin, 256)
        h = jnp.dot(x_ref[...].astype(jnp.bfloat16), w1_ref[...],
                    preferred_element_type=jnp.float32)
        h = jnp.maximum(h + b_ref[b_base:b_base + 1, :], 0.0)
        # Layer 2: (Bp, 256) @ (256, 128)
        h = jnp.dot(h.astype(jnp.bfloat16), w2_ref[w2_slot],
                    preferred_element_type=jnp.float32)
        h = jnp.maximum(h + b_ref[b_base + 1:b_base + 2, :128], 0.0)
        # Layers 3 & 4 (eval-mode Dropout before layer 4 is identity)
        for k in range(2):
            h = jnp.dot(h.astype(jnp.bfloat16), w345_ref[w345_base + k],
                        preferred_element_type=jnp.float32)
            h = jnp.maximum(
                h + b_ref[b_base + 2 + k:b_base + 3 + k, :128], 0.0)
        # Layer 5: final Linear (no BN / ReLU)
        h = jnp.dot(h.astype(jnp.bfloat16), w345_ref[w345_base + 2],
                    preferred_element_type=jnp.float32)
        return h + b_ref[b_base + 4:b_base + 5, :128]

    o_ref[...] = (branch(x_img_ref, w1i_ref, 0, 0, 0) +
                  branch(x_cap_ref, w1c_ref, 1, 3, 5))


# --------------------------------- parameters -------------------------------- #

def _make_branch(key, in_dim, hidden, out_dim, eps):
    """One late_fusion_mlp: raw f32 params + folded/padded/transposed bf16."""
    dims = [in_dim] + list(hidden) + [out_dim]
    raw, folded = [], []
    for i in range(5):
        fin, fout = dims[i], dims[i + 1]
        key, kw, kb, k1, k2, k3, k4 = jax.random.split(key, 7)
        bound = 1.0 / (fin ** 0.5)
        w = jax.random.uniform(kw, (fout, fin), jnp.float32, -bound, bound)  # torch (out,in)
        b = jax.random.uniform(kb, (fout,), jnp.float32, -bound, bound)
        if i < 4:  # Linear followed by eval-mode BatchNorm1d
            gamma = jax.random.uniform(k1, (fout,), jnp.float32, 0.5, 1.5)
            beta = 0.1 * jax.random.normal(k2, (fout,), jnp.float32)
            mean = 0.1 * jax.random.normal(k3, (fout,), jnp.float32)
            var = jax.random.uniform(k4, (fout,), jnp.float32, 0.5, 1.5)
            bn = (gamma, beta, mean, var)
            scale = gamma * jax.lax.rsqrt(var + eps)
            w_f = w * scale[:, None]                    # fold BN scale into W
            b_f = b * scale + (beta - mean * scale)     # fold BN + bias
        else:
            bn = None
            w_f, b_f = w, b
        raw.append((w, b, bn))
        fin_p, fout_p = _pad_to(fin, 128), _pad_to(fout, 128)
        w_pT = (jnp.zeros((fin_p, fout_p), jnp.float32)
                .at[:fin, :fout].set(w_f.T).astype(jnp.bfloat16))
        b_p = jnp.zeros((fout_p,), jnp.float32).at[:fout].set(b_f)
        folded.append((w_pT, b_p))
    pdims = [_pad_to(d, 128) for d in dims]
    return key, raw, folded, pdims


def init_params(key, arg, eps=1e-5):
    """All folding / padding / transposition / dtype conversion done ONCE."""
    hidden = list(arg['hidden_dim'])
    out_dim = arg['output_dim']
    d_img_in = 141 + arg['img_embs_size']
    d_cap_in = 141 + (128 if arg['caption_version'] == 'short' else 768)

    key, raw_img, fold_img, img_pdims = _make_branch(key, d_img_in, hidden, out_dim, eps)
    key, raw_cap, fold_cap, cap_pdims = _make_branch(key, d_cap_in, hidden, out_dim, eps)

    # ------ pack into a handful of kernel inputs ------
    w1_img = fold_img[0][0]                                   # (768, 256) bf16
    w1_cap = fold_cap[0][0]                                   # (384, 256) bf16
    w2 = jnp.stack([fold_img[1][0], fold_cap[1][0]])          # (2, 256, 128) bf16
    w345 = jnp.stack([fold_img[2][0], fold_img[3][0], fold_img[4][0],
                      fold_cap[2][0], fold_cap[3][0], fold_cap[4][0]])  # (6,128,128)
    bias_slab = jnp.zeros((10, 256), jnp.float32)
    for r, (_, b_p) in enumerate(fold_img):
        bias_slab = bias_slab.at[r, :b_p.shape[0]].set(b_p)
    for r, (_, b_p) in enumerate(fold_cap):
        bias_slab = bias_slab.at[5 + r, :b_p.shape[0]].set(b_p)
    packed = (w1_img, w1_cap, w2, w345, bias_slab)

    cfg = dict(d_img_in=d_img_in, d_cap_in=d_cap_in,
               d_img_pad=img_pdims[0], d_cap_pad=cap_pdims[0],
               out_dim=out_dim, out_pad=img_pdims[-1],
               img_pdims=img_pdims, cap_pdims=cap_pdims, eps=eps)
    raw = {'img': raw_img, 'cap': raw_cap}
    return packed, raw, cfg


# ----------------------------------- forward --------------------------------- #

def make_forward(cfg):
    d_img_in, d_cap_in = cfg['d_img_in'], cfg['d_cap_in']
    d_img_pad, d_cap_pad = cfg['d_img_pad'], cfg['d_cap_pad']
    out_dim, out_pad = cfg['out_dim'], cfg['out_pad']
    macs_per_row = (
        sum(a * b for a, b in zip(cfg['img_pdims'][:-1], cfg['img_pdims'][1:])) +
        sum(a * b for a, b in zip(cfg['cap_pdims'][:-1], cfg['cap_pdims'][1:])))

    @jax.jit
    def forward(packed, user, img_embs, cap):
        B = user.shape[0]
        Bp = _pad_to(max(B, 1), 16)  # 16-row pad: full bf16 sublane tile on MXU feed
        # TODO(synk): self.conv_layer (model_ft) is an external backbone passed
        # to __init__; 'image_inputs' is treated as its precomputed embedding.
        x_img = jnp.concatenate([user.astype(jnp.float32),
                                 img_embs.astype(jnp.float32)], axis=1)
        x_img_p = jnp.pad(x_img, ((0, Bp - B), (0, d_img_pad - d_img_in)))
        x_cap_p = jnp.pad(cap.astype(jnp.float32),
                          ((0, Bp - B), (0, d_cap_pad - d_cap_in)))

        inputs = (x_img_p, x_cap_p) + tuple(packed)
        bytes_accessed = (sum(int(a.size) * a.dtype.itemsize for a in inputs)
                          + Bp * out_pad * 4)

        out = pl.pallas_call(
            _late_fusion_kernel,
            out_shape=jax.ShapeDtypeStruct((Bp, out_pad), jnp.float32),
            grid=(1,),
            in_specs=[pl.BlockSpec(a.shape, lambda i, n=a.ndim: (0,) * n)
                      for a in inputs],
            out_specs=pl.BlockSpec((Bp, out_pad), lambda i: (0, 0)),
            compiler_params=pltpu.CompilerParams(
                dimension_semantics=("arbitrary",),
                vmem_limit_bytes=32 * 1024 * 1024),
            cost_estimate=pl.CostEstimate(
                flops=int(2 * Bp * macs_per_row), transcendentals=0,
                bytes_accessed=int(bytes_accessed)),
        )(*inputs)
        return out[:B, :out_dim]

    return forward


# --------------------------------- pure-JAX ref ------------------------------- #

def reference_forward(user, img_embs, cap, raw, eps=1e-5):
    """Unfused reference from RAW f32 params with explicit eval-mode BatchNorm."""
    def mlp(x, layers):
        for i in range(4):
            w, b, (gamma, beta, mean, var) = layers[i]
            z = x @ w.T + b
            z = (z - mean) * (gamma * jax.lax.rsqrt(var + eps)) + beta
            x = jnp.maximum(z, 0.0)
        w, b, _ = layers[4]
        return x @ w.T + b

    x_img = jnp.concatenate([user, img_embs], axis=1)
    return mlp(x_img, raw['img']) + mlp(cap, raw['cap'])


# ------------------------------------ main ------------------------------------ #

if __name__ == "__main__":
    key = jax.random.PRNGKey(0)
    B = 2
    arg = {
        'hidden_dim': [256, 128, 64, 32],
        'dropout': 0.2,                 # eval-mode Dropout == identity
        'output_dim': 8,
        'img_embs_size': 512,
        'caption_version': 'short',     # caption_mlp input dim = 141 + 128
    }

    k1, k2, k3, k4 = jax.random.split(key, 4)
    user = jax.random.normal(k1, (B, 141), jnp.float32)
    # backbone (model_ft) output stand-in — see TODO(synk) in make_forward.
    img_embs = jax.random.normal(k2, (B, arg['img_embs_size']), jnp.float32)
    cap = jax.random.normal(k3, (B, 141 + 128), jnp.float32)

    packed, raw, cfg = init_params(k4, arg)
    forward = make_forward(cfg)

    out = forward(packed, user, img_embs, cap)
    out = jax.block_until_ready(out)

    ref = reference_forward(user, img_embs, cap, raw, eps=cfg['eps'])
    assert out.shape == (B, arg['output_dim']), out.shape
    assert bool(jnp.all(jnp.isfinite(out)))
    assert bool(jnp.allclose(out, ref, rtol=5e-2, atol=5e-2)), (out, ref)

    print("KERNEL_OK")
</pallas_src>

<mosaic_0001>
module attributes {stable_mosaic.version = 11 : i64} {
  func.func @_late_fusion_kernel(%arg0: i32, %arg1: memref<16x768xf32, #tpu.memory_space<vmem>>, %arg2: memref<16x384xf32, #tpu.memory_space<vmem>>, %arg3: memref<768x256xbf16, #tpu.memory_space<vmem>>, %arg4: memref<384x256xbf16, #tpu.memory_space<vmem>>, %arg5: memref<2x256x128xbf16, #tpu.memory_space<vmem>>, %arg6: memref<6x128x128xbf16, #tpu.memory_space<vmem>>, %arg7: memref<10x256xf32, #tpu.memory_space<vmem>>, %arg8: memref<16x128xf32, #tpu.memory_space<vmem>>) attributes {dimension_semantics = [#tpu.dimension_semantics<arbitrary>], iteration_bounds = array<i64: 1>, scalar_prefetch = 0 : i64, scratch_operands = 0 : i64, tpu.core_type = #tpu.core_type<tc>, window_params = [{pipeline_mode = #tpu.pipeline_mode<synchronous>, transform_indices = @transform_0, window_bounds = array<i64: 16, 768>}, {pipeline_mode = #tpu.pipeline_mode<synchronous>, transform_indices = @transform_1, window_bounds = array<i64: 16, 384>}, {pipeline_mode = #tpu.pipeline_mode<synchronous>, transform_indices = @transform_2, window_bounds = array<i64: 768, 256>}, {pipeline_mode = #tpu.pipeline_mode<synchronous>, transform_indices = @transform_3, window_bounds = array<i64: 384, 256>}, {pipeline_mode = #tpu.pipeline_mode<synchronous>, transform_indices = @transform_4, window_bounds = array<i64: 2, 256, 128>}, {pipeline_mode = #tpu.pipeline_mode<synchronous>, transform_indices = @transform_5, window_bounds = array<i64: 6, 128, 128>}, {pipeline_mode = #tpu.pipeline_mode<synchronous>, transform_indices = @transform_6, window_bounds = array<i64: 10, 256>}, {pipeline_mode = #tpu.pipeline_mode<synchronous>, transform_indices = @transform_7, window_bounds = array<i64: 16, 128>}]} {
    %c0 = arith.constant 0 : index
    %c0_0 = arith.constant 0 : index
    %0 = vector.load %arg1[%c0, %c0_0] : memref<16x768xf32, #tpu.memory_space<vmem>>, vector<16x768xf32>
    %1 = arith.truncf %0 : vector<16x768xf32> to vector<16x768xbf16>
    %c0_1 = arith.constant 0 : index
    %c0_2 = arith.constant 0 : index
    %2 = vector.load %arg3[%c0_1, %c0_2] : memref<768x256xbf16, #tpu.memory_space<vmem>>, vector<768x256xbf16>
    %cst = arith.constant dense<0.000000e+00> : vector<16x256xf32>
    %3 = tpu.matmul %1, %2, %cst {dimension_numbers = #tpu.dot_dimension_numbers<[1], [0], [0], [1], [0, 0, 1, 1], [], []>} : vector<16x768xbf16>, vector<768x256xbf16>, vector<16x256xf32> -> vector<16x256xf32>
    %c0_3 = arith.constant 0 : index
    %c0_4 = arith.constant 0 : index
    %4 = vector.load %arg7[%c0_3, %c0_4] : memref<10x256xf32, #tpu.memory_space<vmem>>, vector<1x256xf32>
    %5 = vector.broadcast %4 : vector<1x256xf32> to vector<16x256xf32>
    %6 = arith.addf %3, %5 : vector<16x256xf32>
    %cst_5 = arith.constant 0.000000e+00 : f32
    %7 = vector.broadcast %cst_5 : f32 to vector<16x256xf32>
    %8 = arith.maximumf %6, %7 : vector<16x256xf32>
    %9 = arith.truncf %8 : vector<16x256xf32> to vector<16x256xbf16>
    %c0_6 = arith.constant 0 : index
    %c0_7 = arith.constant 0 : index
    %c0_8 = arith.constant 0 : index
    %10 = vector.load %arg5[%c0_6, %c0_7, %c0_8] : memref<2x256x128xbf16, #tpu.memory_space<vmem>>, vector<1x256x128xbf16>
    %11 = vector.shape_cast %10 : vector<1x256x128xbf16> to vector<256x128xbf16>
    %cst_9 = arith.constant dense<0.000000e+00> : vector<16x128xf32>
    %12 = tpu.matmul %9, %11, %cst_9 {dimension_numbers = #tpu.dot_dimension_numbers<[1], [0], [0], [1], [0, 0, 1, 1], [], []>} : vector<16x256xbf16>, vector<256x128xbf16>, vector<16x128xf32> -> vector<16x128xf32>
    %c1 = arith.constant 1 : index
    %c0_10 = arith.constant 0 : index
    %13 = vector.load %arg7[%c1, %c0_10] : memref<10x256xf32, #tpu.memory_space<vmem>>, vector<1x128xf32>
    %14 = vector.broadcast %13 : vector<1x128xf32> to vector<16x128xf32>
    %15 = arith.addf %12, %14 : vector<16x128xf32>
    %cst_11 = arith.constant 0.000000e+00 : f32
    %16 = vector.broadcast %cst_11 : f32 to vector<16x128xf32>
    %17 = arith.maximumf %15, %16 : vector<16x128xf32>
    %18 = arith.truncf %17 : vector<16x128xf32> to vector<16x128xbf16>
    %c0_12 = arith.constant 0 : index
    %c0_13 = arith.constant 0 : index
    %c0_14 = arith.constant 0 : index
    %19 = vector.load %arg6[%c0_12, %c0_13, %c0_14] : memref<6x128x128xbf16, #tpu.memory_space<vmem>>, vector<1x128x128xbf16>
    %20 = vector.shape_cast %19 : vector<1x128x128xbf16> to vector<128x128xbf16>
    %cst_15 = arith.constant dense<0.000000e+00> : vector<16x128xf32>
    %21 = tpu.matmul %18, %20, %cst_15 {dimension_numbers = #tpu.dot_dimension_numbers<[1], [0], [0], [1], [0, 0, 1, 1], [], []>} : vector<16x128xbf16>, vector<128x128xbf16>, vector<16x128xf32> -> vector<16x128xf32>
    %c2 = arith.constant 2 : index
    %c0_16 = arith.constant 0 : index
    %22 = vector.load %arg7[%c2, %c0_16] : memref<10x256xf32, #tpu.memory_space<vmem>>, vector<1x128xf32>
    %23 = vector.broadcast %22 : vector<1x128xf32> to vector<16x128xf32>
    %24 = arith.addf %21, %23 : vector<16x128xf32>
    %cst_17 = arith.constant 0.000000e+00 : f32
    %25 = vector.broadcast %cst_17 : f32 to vector<16x128xf32>
    %26 = arith.maximumf %24, %25 : vector<16x128xf32>
    %27 = arith.truncf %26 : vector<16x128xf32> to vector<16x128xbf16>
    %c1_18 = arith.constant 1 : index
    %c0_19 = arith.constant 0 : index
    %c0_20 = arith.constant 0 : index
    %28 = vector.load %arg6[%c1_18, %c0_19, %c0_20] : memref<6x128x128xbf16, #tpu.memory_space<vmem>>, vector<1x128x128xbf16>
    %29 = vector.shape_cast %28 : vector<1x128x128xbf16> to vector<128x128xbf16>
    %cst_21 = arith.constant dense<0.000000e+00> : vector<16x128xf32>
    %30 = tpu.matmul %27, %29, %cst_21 {dimension_numbers = #tpu.dot_dimension_numbers<[1], [0], [0], [1], [0, 0, 1, 1], [], []>} : vector<16x128xbf16>, vector<128x128xbf16>, vector<16x128xf32> -> vector<16x128xf32>
    %c3 = arith.constant 3 : index
    %c0_22 = arith.constant 0 : index
    %31 = vector.load %arg7[%c3, %c0_22] : memref<10x256xf32, #tpu.memory_space<vmem>>, vector<1x128xf32>
    %32 = vector.broadcast %31 : vector<1x128xf32> to vector<16x128xf32>
    %33 = arith.addf %30, %32 : vector<16x128xf32>
    %cst_23 = arith.constant 0.000000e+00 : f32
    %34 = vector.broadcast %cst_23 : f32 to vector<16x128xf32>
    %35 = arith.maximumf %33, %34 : vector<16x128xf32>
    %36 = arith.truncf %35 : vector<16x128xf32> to vector<16x128xbf16>
    %c2_24 = arith.constant 2 : index
    %c0_25 = arith.constant 0 : index
    %c0_26 = arith.constant 0 : index
    %37 = vector.load %arg6[%c2_24, %c0_25, %c0_26] : memref<6x128x128xbf16, #tpu.memory_space<vmem>>, vector<1x128x128xbf16>
    %38 = vector.shape_cast %37 : vector<1x128x128xbf16> to vector<128x128xbf16>
    %cst_27 = arith.constant dense<0.000000e+00> : vector<16x128xf32>
    %39 = tpu.matmul %36, %38, %cst_27 {dimension_numbers = #tpu.dot_dimension_numbers<[1], [0], [0], [1], [0, 0, 1, 1], [], []>} : vector<16x128xbf16>, vector<128x128xbf16>, vector<16x128xf32> -> vector<16x128xf32>
    %c4 = arith.constant 4 : index
    %c0_28 = arith.constant 0 : index
    %40 = vector.load %arg7[%c4, %c0_28] : memref<10x256xf32, #tpu.memory_space<vmem>>, vector<1x128xf32>
    %41 = vector.broadcast %40 : vector<1x128xf32> to vector<16x128xf32>
    %42 = arith.addf %39, %41 : vector<16x128xf32>
    %c0_29 = arith.constant 0 : index
    %c0_30 = arith.constant 0 : index
    %43 = vector.load %arg2[%c0_29, %c0_30] : memref<16x384xf32, #tpu.memory_space<vmem>>, vector<16x384xf32>
    %44 = arith.truncf %43 : vector<16x384xf32> to vector<16x384xbf16>
    %c0_31 = arith.constant 0 : index
    %c0_32 = arith.constant 0 : index
    %45 = vector.load %arg4[%c0_31, %c0_32] : memref<384x256xbf16, #tpu.memory_space<vmem>>, vector<384x256xbf16>
    %cst_33 = arith.constant dense<0.000000e+00> : vector<16x256xf32>
    %46 = tpu.matmul %44, %45, %cst_33 {dimension_numbers = #tpu.dot_dimension_numbers<[1], [0], [0], [1], [0, 0, 1, 1], [], []>} : vector<16x384xbf16>, vector<384x256xbf16>, vector<16x256xf32> -> vector<16x256xf32>
    %c5 = arith.constant 5 : index
    %c0_34 = arith.constant 0 : index
    %47 = vector.load %arg7[%c5, %c0_34] : memref<10x256xf32, #tpu.memory_space<vmem>>, vector<1x256xf32>
    %48 = vector.broadcast %47 : vector<1x256xf32> to vector<16x256xf32>
    %49 = arith.addf %46, %48 : vector<16x256xf32>
    %cst_35 = arith.constant 0.000000e+00 : f32
    %50 = vector.broadcast %cst_35 : f32 to vector<16x256xf32>
    %51 = arith.maximumf %49, %50 : vector<16x256xf32>
    %52 = arith.truncf %51 : vector<16x256xf32> to vector<16x256xbf16>
    %c1_36 = arith.constant 1 : index
    %c0_37 = arith.constant 0 : index
    %c0_38 = arith.constant 0 : index
    %53 = vector.load %arg5[%c1_36, %c0_37, %c0_38] : memref<2x256x128xbf16, #tpu.memory_space<vmem>>, vector<1x256x128xbf16>
    %54 = vector.shape_cast %53 : vector<1x256x128xbf16> to vector<256x128xbf16>
    %cst_39 = arith.constant dense<0.000000e+00> : vector<16x128xf32>
    %55 = tpu.matmul %52, %54, %cst_39 {dimension_numbers = #tpu.dot_dimension_numbers<[1], [0], [0], [1], [0, 0, 1, 1], [], []>} : vector<16x256xbf16>, vector<256x128xbf16>, vector<16x128xf32> -> vector<16x128xf32>
    %c6 = arith.constant 6 : index
    %c0_40 = arith.constant 0 : index
    %56 = vector.load %arg7[%c6, %c0_40] : memref<10x256xf32, #tpu.memory_space<vmem>>, vector<1x128xf32>
    %57 = vector.broadcast %56 : vector<1x128xf32> to vector<16x128xf32>
    %58 = arith.addf %55, %57 : vector<16x128xf32>
    %cst_41 = arith.constant 0.000000e+00 : f32
    %59 = vector.broadcast %cst_41 : f32 to vector<16x128xf32>
    %60 = arith.maximumf %58, %59 : vector<16x128xf32>
    %61 = arith.truncf %60 : vector<16x128xf32> to vector<16x128xbf16>
    %c3_42 = arith.constant 3 : index
    %c0_43 = arith.constant 0 : index
    %c0_44 = arith.constant 0 : index
    %62 = vector.load %arg6[%c3_42, %c0_43, %c0_44] : memref<6x128x128xbf16, #tpu.memory_space<vmem>>, vector<1x128x128xbf16>
    %63 = vector.shape_cast %62 : vector<1x128x128xbf16> to vector<128x128xbf16>
    %cst_45 = arith.constant dense<0.000000e+00> : vector<16x128xf32>
    %64 = tpu.matmul %61, %63, %cst_45 {dimension_numbers = #tpu.dot_dimension_numbers<[1], [0], [0], [1], [0, 0, 1, 1], [], []>} : vector<16x128xbf16>, vector<128x128xbf16>, vector<16x128xf32> -> vector<16x128xf32>
    %c7 = arith.constant 7 : index
    %c0_46 = arith.constant 0 : index
    %65 = vector.load %arg7[%c7, %c0_46] : memref<10x256xf32, #tpu.memory_space<vmem>>, vector<1x128xf32>
    %66 = vector.broadcast %65 : vector<1x128xf32> to vector<16x128xf32>
    %67 = arith.addf %64, %66 : vector<16x128xf32>
    %cst_47 = arith.constant 0.000000e+00 : f32
    %68 = vector.broadcast %cst_47 : f32 to vector<16x128xf32>
    %69 = arith.maximumf %67, %68 : vector<16x128xf32>
    %70 = arith.truncf %69 : vector<16x128xf32> to vector<16x128xbf16>
    %c4_48 = arith.constant 4 : index
    %c0_49 = arith.constant 0 : index
    %c0_50 = arith.constant 0 : index
    %71 = vector.load %arg6[%c4_48, %c0_49, %c0_50] : memref<6x128x128xbf16, #tpu.memory_space<vmem>>, vector<1x128x128xbf16>
    %72 = vector.shape_cast %71 : vector<1x128x128xbf16> to vector<128x128xbf16>
    %cst_51 = arith.constant dense<0.000000e+00> : vector<16x128xf32>
    %73 = tpu.matmul %70, %72, %cst_51 {dimension_numbers = #tpu.dot_dimension_numbers<[1], [0], [0], [1], [0, 0, 1, 1], [], []>} : vector<16x128xbf16>, vector<128x128xbf16>, vector<16x128xf32> -> vector<16x128xf32>
    %c8 = arith.constant 8 : index
    %c0_52 = arith.constant 0 : index
    %74 = vector.load %arg7[%c8, %c0_52] : memref<10x256xf32, #tpu.memory_space<vmem>>, vector<1x128xf32>
    %75 = vector.broadcast %74 : vector<1x128xf32> to vector<16x128xf32>
    %76 = arith.addf %73, %75 : vector<16x128xf32>
    %cst_53 = arith.constant 0.000000e+00 : f32
    %77 = vector.broadcast %cst_53 : f32 to vector<16x128xf32>
    %78 = arith.maximumf %76, %77 : vector<16x128xf32>
    %79 = arith.truncf %78 : vector<16x128xf32> to vector<16x128xbf16>
    %c5_54 = arith.constant 5 : index
    %c0_55 = arith.constant 0 : index
    %c0_56 = arith.constant 0 : index
    %80 = vector.load %arg6[%c5_54, %c0_55, %c0_56] : memref<6x128x128xbf16, #tpu.memory_space<vmem>>, vector<1x128x128xbf16>
    %81 = vector.shape_cast %80 : vector<1x128x128xbf16> to vector<128x128xbf16>
    %cst_57 = arith.constant dense<0.000000e+00> : vector<16x128xf32>
    %82 = tpu.matmul %79, %81, %cst_57 {dimension_numbers = #tpu.dot_dimension_numbers<[1], [0], [0], [1], [0, 0, 1, 1], [], []>} : vector<16x128xbf16>, vector<128x128xbf16>, vector<16x128xf32> -> vector<16x128xf32>
    %c9 = arith.constant 9 : index
    %c0_58 = arith.constant 0 : index
    %83 = vector.load %arg7[%c9, %c0_58] : memref<10x256xf32, #tpu.memory_space<vmem>>, vector<1x128xf32>
    %84 = vector.broadcast %83 : vector<1x128xf32> to vector<16x128xf32>
    %85 = arith.addf %82, %84 : vector<16x128xf32>
    %86 = arith.addf %42, %85 : vector<16x128xf32>
    %c0_59 = arith.constant 0 : index
    %c0_60 = arith.constant 0 : index
    %87 = vector.load %arg8[%c0_59, %c0_60] : memref<16x128xf32, #tpu.memory_space<vmem>>, vector<16x128xf32>
    tpu.vector_store %arg8[%c0_59, %c0_60], %86 {strides = array<i32>} : memref<16x128xf32, #tpu.memory_space<vmem>>, vector<16x128xf32>,
    return
  }
  func.func @transform_0(%arg0: i32) -> (i32, i32) {
    %c0_i32 = arith.constant 0 : i32
    %c0_i32_0 = arith.constant 0 : i32
    %c0_i32_1 = arith.constant 0 : i32
    return %c0_i32, %c0_i32_0 : i32, i32
  }
  func.func @transform_1(%arg0: i32) -> (i32, i32) {
    %c0_i32 = arith.constant 0 : i32
    %c0_i32_0 = arith.constant 0 : i32
    %c0_i32_1 = arith.constant 0 : i32
    return %c0_i32, %c0_i32_0 : i32, i32
  }
  func.func @transform_2(%arg0: i32) -> (i32, i32) {
    %c0_i32 = arith.constant 0 : i32
    %c0_i32_0 = arith.constant 0 : i32
    %c0_i32_1 = arith.constant 0 : i32
    return %c0_i32, %c0_i32_0 : i32, i32
  }
  func.func @transform_3(%arg0: i32) -> (i32, i32) {
    %c0_i32 = arith.constant 0 : i32
    %c0_i32_0 = arith.constant 0 : i32
    %c0_i32_1 = arith.constant 0 : i32
    return %c0_i32, %c0_i32_0 : i32, i32
  }
  func.func @transform_4(%arg0: i32) -> (i32, i32, i32) {
    %c0_i32 = arith.constant 0 : i32
    %c0_i32_0 = arith.constant 0 : i32
    %c0_i32_1 = arith.constant 0 : i32
    %c0_i32_2 = arith.constant 0 : i32
    return %c0_i32, %c0_i32_0, %c0_i32_1 : i32, i32, i32
  }
  func.func @transform_5(%arg0: i32) -> (i32, i32, i32) {
    %c0_i32 = arith.constant 0 : i32
    %c0_i32_0 = arith.constant 0 : i32
    %c0_i32_1 = arith.constant 0 : i32
    %c0_i32_2 = arith.constant 0 : i32
    return %c0_i32, %c0_i32_0, %c0_i32_1 : i32, i32, i32
  }
  func.func @transform_6(%arg0: i32) -> (i32, i32) {
    %c0_i32 = arith.constant 0 : i32
    %c0_i32_0 = arith.constant 0 : i32
    %c0_i32_1 = arith.constant 0 : i32
    return %c0_i32, %c0_i32_0 : i32, i32
  }
  func.func @transform_7(%arg0: i32) -> (i32, i32) {
    %c0_i32 = arith.constant 0 : i32
    %c0_i32_0 = arith.constant 0 : i32
    %c0_i32_1 = arith.constant 0 : i32
    return %c0_i32, %c0_i32_0 : i32, i32
  }
}

</mosaic_0001>

<bundles_post_ra>
// kernel: forward.1
= control target key start
LH: loop header
LB: loop body
LE: loop exit
PB: predicated region body
PF: predicated region fallthrough
CT: control target
= control target key end

     0   :  { %12 = vsyncpa [#allocation3], 0  ;;  %s3376_s0 = inlined_call_operand.vmem [shape: f32[16,768], index: 0, kind: input, shape index: {}]   ;;  %s3377_s1 = inlined_call_operand.vmem [shape: f32[16,384], index: 1, kind: input, shape index: {}]   ;;  %s3378_s2 = inlined_call_operand.hbm [shape: bf16[768,256], index: 2, kind: input, shape index: {}]   ;;  %s3379_s3 = inlined_call_operand.hbm [shape: bf16[384,256], index: 3, kind: input, shape index: {}]   ;;  %s3380_s4 = inlined_call_operand.hbm [shape: bf16[2,256,128], index: 4, kind: input, shape index: {}]   ;;  %s3381_s5 = inlined_call_operand.hbm [shape: bf16[6,128,128], index: 5, kind: input, shape index: {}]   ;;  %s3382_s6 = inlined_call_operand.vmem [shape: f32[10,256], index: 6, kind: input, shape index: {}]   ;;  %s3383_s7 = inlined_call_operand.vmem [shape: f32[16,128], index: 7, kind: output, shape index: {}]  }
   0x1   :  { %13 = vsyncpa [#allocation5], 0 }
   0x2   :  { %14 = vsyncpa [#allocation8], 0  ;;  %s3108_s24 = smov [#allocation4]   ;;  %s3109_s26 = smov [#allocation2]  }
   0x3   :  { %s36_s25 = sshll.u32 %s3108_s24, 4  ;;  %s24_s27 = sshll.u32 %s3109_s26, 4  ;;  %s37_s25 = int_to_ptr.vmem [resolvable:$true] %s36_s25  ;;  %s3159_s27 = int_to_ptr.vmem [resolvable:$true] %s24_s27 }
   0x4   :  { %s3014_s30 = scalar_lea.hbm %s3379_s3, 6144 }
   0x5   :  { %p3015_p0 = scmp.ne.s32.totalorder %s3379_s3, %s3014_s30  ;;  %p3018_p1 = scmp.lt.u32.totalorder %s3014_s30, %s3379_s3 }
   0x7   :  { %p3020_p2 = pnand %p3018_p1, %p3015_p0 }
   0x9   :  { %3023 = shalt.err (!%p3020_p2)
}
   0xa   :  { %s3024_s12 = scalar_lea.vmem %s37_s25, 6144  ;;  %p3029_p4 = scmp.lt.s32.totalorder %s37_s25, %s37_s25 }
   0xb   :  { %p3025_p3 = scmp.ne.s32.totalorder %s37_s25, %s3024_s12  ;;  %p3030_p5 = scmp.lt.s32.totalorder %s3024_s12, %s3024_s12 }
   0xd   :  { %p3031_p6 = por %p3030_p5, %p3029_p4 }
   0xf   :  { %p3032_p7 = pnand %p3031_p6, %p3025_p3 }
  0x11   :  { %3035 = shalt.err (!%p3032_p7)
}
  0x12   :  { %s3110_s13 = smov 128   ;;  %s3111_s14 = smov 8  }
  0x13   :  { %42 = dma.hbm_to_vmem [thread:$0]  %s3379_s3, 6144, %s37_s25, [#allocation5], %s3110_s13, %s3110_s13, %s3111_s14  }
  0x14   :  { %s3036_s19 = scalar_lea.hbm %s3378_s2, 12288 }
  0x15   :  { %p3037_p8 = scmp.ne.s32.totalorder %s3378_s2, %s3036_s19  ;;  %p3040_p9 = scmp.lt.u32.totalorder %s3036_s19, %s3378_s2 }
  0x17   :  { %p3042_p10 = pnand %p3040_p9, %p3037_p8 }
  0x19   :  { %3045 = shalt.err (!%p3042_p10)
}
  0x1a   :  { %s3046_s24 = scalar_lea.vmem %s3159_s27, 12288  ;;  %p3051_p12 = scmp.lt.s32.totalorder %s3159_s27, %s3159_s27 }
  0x1b   :  { %p3047_p11 = scmp.ne.s32.totalorder %s3159_s27, %s3046_s24  ;;  %p3052_p13 = scmp.lt.s32.totalorder %s3046_s24, %s3046_s24 }
  0x1d   :  { %p3053_p0 = por %p3052_p13, %p3051_p12 }
  0x1f   :  { %p3054_p1 = pnand %p3053_p0, %p3047_p11 }
  0x21   :  { %3057 = shalt.err (!%p3054_p1)
}
  0x22   :  { %30 = dma.hbm_to_vmem [thread:$0]  %s3378_s2, 12288, %s3159_s27, [#allocation3], %s3110_s13, %s3110_s13, %s3111_s14  }
  0x23   :  { %s3112_s26 = smov [#allocation6]   ;;  %s3058_s8 = scalar_lea.hbm %s3380_s4, 4096 }
  0x24   :  { %s48_s28 = sshll.u32 %s3112_s26, 4  ;;  %p3059_p2 = scmp.ne.s32.totalorder %s3380_s4, %s3058_s8  ;;  %s49_s28 = int_to_ptr.vmem [resolvable:$true] %s48_s28 }
  0x25   :  { %p3062_p3 = scmp.lt.u32.totalorder %s3058_s8, %s3380_s4 }
  0x27   :  { %p3064_p4 = pnand %p3062_p3, %p3059_p2 }
  0x29   :  { %3067 = shalt.err (!%p3064_p4)
}
  0x2a   :  { %s3068_s15 = scalar_lea.vmem %s49_s28, 4096  ;;  %p3073_p6 = scmp.lt.s32.totalorder %s49_s28, %s49_s28 }
  0x2b   :  { %p3069_p5 = scmp.ne.s32.totalorder %s49_s28, %s3068_s15  ;;  %p3074_p7 = scmp.lt.s32.totalorder %s3068_s15, %s3068_s15 }
  0x2d   :  { %p3075_p8 = por %p3074_p7, %p3073_p6 }
  0x2f   :  { %p3076_p9 = pnand %p3075_p8, %p3069_p5 }
  0x31   :  { %3079 = shalt.err (!%p3076_p9)
}
  0x32   :  { %s3113_s2 = smov 64   ;;  %s3114_s27 = smov 4  }
  0x33   :  { %54 = dma.hbm_to_vmem [thread:$0]  %s3380_s4, 4096, %s49_s28, [#allocation5], %s3113_s2, %s3113_s2, %s3114_s27  }
  0x34   :  { %s3115_s16 = smov [#allocation7]   ;;  %s3080_s20 = scalar_lea.hbm %s3381_s5, 6144 }
  0x35   :  { %s60_s17 = sshll.u32 %s3115_s16, 4  ;;  %p3081_p10 = scmp.ne.s32.totalorder %s3381_s5, %s3080_s20  ;;  %s61_s17 = int_to_ptr.vmem [resolvable:$true] %s60_s17 }
  0x36   :  { %p3084_p11 = scmp.lt.u32.totalorder %s3080_s20, %s3381_s5 }
  0x38   :  { %p3086_p12 = pnand %p3084_p11, %p3081_p10 }
  0x3a   :  { %3089 = shalt.err (!%p3086_p12)
}
  0x3b   :  { %s3090_s3 = scalar_lea.vmem %s61_s17, 6144  ;;  %p3095_p0 = scmp.lt.s32.totalorder %s61_s17, %s61_s17 }
  0x3c   :  { %p3091_p13 = scmp.ne.s32.totalorder %s61_s17, %s3090_s3  ;;  %p3096_p1 = scmp.lt.s32.totalorder %s3090_s3, %s3090_s3 }
  0x3e   :  { %p3097_p2 = por %p3096_p1, %p3095_p0 }
  0x40   :  { %p3098_p3 = pnand %p3097_p2, %p3091_p13 }
  0x42   :  { %3101 = shalt.err (!%p3098_p3)
}
  0x43   :  { %66 = dma.hbm_to_vmem [thread:$0]  %s3381_s5, 6144, %s61_s17, [#allocation8], %s3113_s2, %s3113_s2, %s3114_s27  }
  0x44   :  { %3102 = dma.done.wait [#allocation3], 12288  }
  0x45   :  { %3103 = vsyncadd [#allocation3], 4294955008 }
  0x46   :  { %3104 = dma.done.wait [#allocation5], 10240  }
  0x47   :  { %3105 = vsyncadd [#allocation5], 4294957056 }
  0x48   :  { %3106 = dma.done.wait [#allocation8], 6144  }
  0x49   :  { %3107 = vsyncadd [#allocation8], 4294961152  ;;  %v2718_v0 = vld [vmem:[#allocation2 + $0x4] ss:$8 sps:$4 sm:$0xff]   ;;  %v2720_v1 = vld [vmem:[#allocation2] ss:$8 sps:$4 sm:$0xff]  }
  0x4a   :  { %688 = vmatprep.subr.bf16.mxu0 %v2718_v0  ;;  %v2721_v2 = vld [vmem:[#allocation2 + $0x14] ss:$8 sps:$4 sm:$0xff]   ;;  %v2723_v3 = vld [vmem:[#allocation2 + $0x10] ss:$8 sps:$4 sm:$0xff]   ;;  %v2724_v4 = vld [vmem:[#allocation2 + $0x24] ss:$8 sps:$4 sm:$0xff]  }
  0x4b   :  { %689 = vmatpush1.bf16.msra.mxu0 %v2720_v1  ;;  %v2726_v5 = vld [vmem:[#allocation2 + $0x20] ss:$8 sps:$4 sm:$0xff]   ;;  %v2727_v6 = vld [vmem:[#allocation2 + $0x34] ss:$8 sps:$4 sm:$0xff]   ;;  %v2729_v7 = vld [vmem:[#allocation2 + $0x30] ss:$8 sps:$4 sm:$0xff]  }
  0x4c   :  { %690 = vmatprep.subr.bf16.mxu0 %v2721_v2  ;;  %v2730_v8 = vld [vmem:[#allocation2 + $0x44] ss:$8 sps:$4 sm:$0xff]   ;;  %v2732_v9 = vld [vmem:[#allocation2 + $0x40] ss:$8 sps:$4 sm:$0xff]   ;;  %v2733_v10 = vld [vmem:[#allocation2 + $0x54] ss:$8 sps:$4 sm:$0xff]  }
  0x4d   :  { %v2735_v11 = vld [vmem:[#allocation2 + $0x50] ss:$8 sps:$4 sm:$0xff]   ;;  %v2736_v12 = vld [vmem:[#allocation2 + $0x64] ss:$8 sps:$4 sm:$0xff]   ;;  %v2738_v16 = vld [vmem:[#allocation2 + $0x60] ss:$8 sps:$4 sm:$0xff]  }
  0x4e   :  { %v83_v13 = vld [vmem:[%s3376_s0 + $0x8] sm:$0xff]  ;;  %v89_v14 = vld [vmem:[%s3376_s0 + $0x38] sm:$0xff]  ;;  %v82_v36 = vld [vmem:[%s3376_s0] sm:$0xff]  ;;  %vm3117_vm0 = vmmov 0  }
  0x4f   :  { %691 = vmatpush1.bf16.msra.mxu0 %v2723_v3  ;;  %v95_v15 = vpack.c.bf16 %v89_v14, %v83_v13  ;;  %v2739_v17 = vld [vmem:[#allocation2 + $0x74] ss:$8 sps:$4 sm:$0xff]   ;;  %v2741_v18 = vld [vmem:[#allocation2 + $0x70] ss:$8 sps:$4 sm:$0xff]   ;;  %v2742_v19 = vld [vmem:[#allocation2 + $0x84] ss:$8 sps:$4 sm:$0xff]  }
  0x50   :  { %692 = vmatprep.subr.bf16.mxu0 %v2724_v4  ;;  %v2744_v20 = vld [vmem:[#allocation2 + $0x80] ss:$8 sps:$4 sm:$0xff]   ;;  %v2745_v21 = vld [vmem:[#allocation2 + $0x94] ss:$8 sps:$4 sm:$0xff]   ;;  %v2747_v22 = vld [vmem:[#allocation2 + $0x90] ss:$8 sps:$4 sm:$0xff]  }
  0x51   :  { %720 = vmatprep.mubr.bf16.mxu0 %v95_v15  ;;  %v2748_v23 = vld [vmem:[#allocation2 + $0xa4] ss:$8 sps:$4 sm:$0xff]   ;;  %v2750_v24 = vld [vmem:[#allocation2 + $0xa0] ss:$8 sps:$4 sm:$0xff]   ;;  %v2751_v25 = vld [vmem:[#allocation2 + $0xb4] ss:$8 sps:$4 sm:$0xff]  }
  0x52   :  { %v2753_v26 = vld [vmem:[#allocation2 + $0xb0] ss:$8 sps:$4 sm:$0xff]   ;;  %v2754_v27 = vld [vmem:[#allocation2 + $0xc4] ss:$8 sps:$4 sm:$0xff]   ;;  %v2756_v28 = vld [vmem:[#allocation2 + $0xc0] ss:$8 sps:$4 sm:$0xff]  }
  0x53   :  { %693 = vmatpush1.bf16.msra.mxu0 %v2726_v5  ;;  %v2757_v29 = vld [vmem:[#allocation2 + $0xd4] ss:$8 sps:$4 sm:$0xff]   ;;  %v2759_v30 = vld [vmem:[#allocation2 + $0xd0] ss:$8 sps:$4 sm:$0xff]   ;;  %v2760_v31 = vld [vmem:[#allocation2 + $0xe4] ss:$8 sps:$4 sm:$0xff]  }
  0x54   :  { %694 = vmatprep.subr.bf16.mxu0 %v2727_v6  ;;  %v2762_v32 = vld [vmem:[#allocation2 + $0xe0] ss:$8 sps:$4 sm:$0xff]   ;;  %v2763_v33 = vld [vmem:[#allocation2 + $0xf4] ss:$8 sps:$4 sm:$0xff]   ;;  %v2765_v34 = vld [vmem:[#allocation2 + $0xf0] ss:$8 sps:$4 sm:$0xff]  }
  0x55   :  { %v2768_v35 = vld [vmem:[#allocation2 + $0x104] ss:$8 sps:$4 sm:$0xff]   ;;  %v88_v37 = vld [vmem:[%s3376_s0 + $0x30] sm:$0xff]  ;;  %v85_v38 = vld [vmem:[%s3376_s0 + $0x18] sm:$0xff] }
  0x56   :  { %v91_v39 = vld [vmem:[%s3376_s0 + $0x48] sm:$0xff]  ;;  %v94_v40 = vpack.c.bf16 %v88_v37, %v82_v36  ;;  %v2771_v43 = vld [vmem:[#allocation2 + $0x114] ss:$8 sps:$4 sm:$0xff]   ;;  %v2769_v44 = vld [vmem:[#allocation2 + $0x110] ss:$8 sps:$4 sm:$0xff]  }
  0x57   :  { %695 = vmatpush1.bf16.msra.mxu0 %v2729_v7  ;;  %v2766_v41 = vld [vmem:[#allocation2 + $0x100] ss:$8 sps:$4 sm:$0xff]   ;;  %v97_v42 = vpack.c.bf16 %v91_v39, %v85_v38  ;;  %v2774_v45 = vld [vmem:[#allocation2 + $0x124] ss:$8 sps:$4 sm:$0xff]   ;;  %v2777_v49 = vld [vmem:[#allocation2 + $0x134] ss:$8 sps:$4 sm:$0xff]  }
  0x58   :  { %696 = vmatprep.subr.bf16.mxu0 %v2730_v8  ;;  %v2862_v46 = vld [vmem:[#allocation6 + $0x40] sm:$0xff]   ;;  %v2864_v50 = vld [vmem:[#allocation6 + $0x48] sm:$0xff]   ;;  %v2866_v52 = vld [vmem:[#allocation6 + $0x50] sm:$0xff]  }
  0x59   :  { %v2772_v47 = vld [vmem:[#allocation2 + $0x120] ss:$8 sps:$4 sm:$0xff]   ;;  %2461 = vmatprep.subr.bf16.mxu1 %v2862_v46  ;;  %v2775_v53 = vld [vmem:[#allocation2 + $0x130] ss:$8 sps:$4 sm:$0xff]   ;;  %v2780_v54 = vld [vmem:[#allocation2 + $0x144] ss:$8 sps:$4 sm:$0xff]  }
  0x5a   :  { %v2863_v48 = vld [vmem:[#allocation6] sm:$0xff]   ;;  %v2865_v51 = vld [vmem:[#allocation6 + $0x8] sm:$0xff]   ;;  %v2867_v55 = vld [vmem:[#allocation6 + $0x10] sm:$0xff]  }
  0x5b   :  { %697 = vmatpush1.bf16.msra.mxu0 %v2732_v9  ;;  %2462 = vmatpush3.bf16.msra.mxu1 %v2863_v48  ;;  %v2868_v56 = vld [vmem:[#allocation6 + $0x58] sm:$0xff]   ;;  %v2778_v57 = vld [vmem:[#allocation2 + $0x140] ss:$8 sps:$4 sm:$0xff]   ;;  %v2786_v63 = vld [vmem:[#allocation2 + $0x164] ss:$8 sps:$4 sm:$0xff]  }
  0x5c   :  { %698 = vmatprep.subr.bf16.mxu0 %v2733_v10  ;;  %2463 = vmatprep.subr.bf16.mxu1 %v2864_v50  ;;  %v2783_v58 = vld [vmem:[#allocation2 + $0x154] ss:$8 sps:$4 sm:$0xff]   ;;  %v2870_v60 = vld [vmem:[#allocation6 + $0x60] sm:$0xff]   ;;  %v2781_v61 = vld [vmem:[#allocation2 + $0x150] ss:$8 sps:$4 sm:$0xff]  }
  0x5d   :  { %v2869_v59 = vld [vmem:[#allocation6 + $0x18] sm:$0xff]   ;;  %v2871_v62 = vld [vmem:[#allocation6 + $0x20] sm:$0xff]   ;;  %v2872_v0 = vld [vmem:[#allocation6 + $0x68] sm:$0xff]  }
  0x5e   :  { %v2784_v1 = vld [vmem:[#allocation2 + $0x160] ss:$8 sps:$4 sm:$0xff]   ;;  %v2789_v2 = vld [vmem:[#allocation2 + $0x174] ss:$8 sps:$4 sm:$0xff]   ;;  %v2787_v3 = vld [vmem:[#allocation2 + $0x170] ss:$8 sps:$4 sm:$0xff]  }
  0x5f   :  { %699 = vmatpush1.bf16.msra.mxu0 %v2735_v11  ;;  %2464 = vmatpush3.bf16.msra.mxu1 %v2865_v51  ;;  %v2792_v4 = vld [vmem:[#allocation2 + $0x184] ss:$8 sps:$4 sm:$0xff]   ;;  %v2790_v5 = vld [vmem:[#allocation2 + $0x180] ss:$8 sps:$4 sm:$0xff]   ;;  %v2795_v6 = vld [vmem:[#allocation2 + $0x194] ss:$8 sps:$4 sm:$0xff]  }
  0x60   :  { %700 = vmatprep.subr.bf16.mxu0 %v2736_v12  ;;  %2465 = vmatprep.subr.bf16.mxu1 %v2866_v52  ;;  %v2793_v7 = vld [vmem:[#allocation2 + $0x190] ss:$8 sps:$4 sm:$0xff]   ;;  %v2798_v8 = vld [vmem:[#allocation2 + $0x1a4] ss:$8 sps:$4 sm:$0xff]   ;;  %v2796_v9 = vld [vmem:[#allocation2 + $0x1a0] ss:$8 sps:$4 sm:$0xff]  }
  0x61   :  { %v2801_v10 = vld [vmem:[#allocation2 + $0x1b4] ss:$8 sps:$4 sm:$0xff]   ;;  %v2799_v11 = vld [vmem:[#allocation2 + $0x1b0] ss:$8 sps:$4 sm:$0xff]   ;;  %v2804_v12 = vld [vmem:[#allocation2 + $0x1c4] ss:$8 sps:$4 sm:$0xff]  }
  0x62   :  { %v2802_v13 = vld [vmem:[#allocation2 + $0x1c0] ss:$8 sps:$4 sm:$0xff]   ;;  %v2807_v14 = vld [vmem:[#allocation2 + $0x1d4] ss:$8 sps:$4 sm:$0xff]   ;;  %v2805_v15 = vld [vmem:[#allocation2 + $0x1d0] ss:$8 sps:$4 sm:$0xff]  }
  0x63   :  { %701 = vmatpush1.bf16.msra.mxu0 %v2738_v16  ;;  %2466 = vmatpush3.bf16.msra.mxu1 %v2867_v55  ;;  %v2810_v16 = vld [vmem:[#allocation2 + $0x1e4] ss:$8 sps:$4 sm:$0xff]   ;;  %v2831_v36 = vld [vmem:[#allocation2 + $0x254] ss:$8 sps:$4 sm:$0xff]   ;;  %v2829_v37 = vld [vmem:[#allocation2 + $0x250] ss:$8 sps:$4 sm:$0xff]  }
  0x64   :  { %702 = vmatprep.subr.bf16.mxu0 %v2739_v17  ;;  %2467 = vmatprep.subr.bf16.mxu1 %v2868_v56  ;;  %v2808_v17 = vld [vmem:[#allocation2 + $0x1e0] ss:$8 sps:$4 sm:$0xff]   ;;  %v2834_v38 = vld [vmem:[#allocation2 + $0x264] ss:$8 sps:$4 sm:$0xff]   ;;  %v2849_v48 = vld [vmem:[#allocation2 + $0x2b4] ss:$8 sps:$4 sm:$0xff]  }
  0x65   :  { %v2832_v39 = vld [vmem:[#allocation2 + $0x260] ss:$8 sps:$4 sm:$0xff]   ;;  %v2846_v46 = vld [vmem:[#allocation2 + $0x2a4] ss:$8 sps:$4 sm:$0xff]   ;;  %v2855_v52 = vld [vmem:[#allocation2 + $0x2d4] ss:$8 sps:$4 sm:$0xff]  }
  0x66   :  { %v2852_v50 = vld [vmem:[#allocation2 + $0x2c4] ss:$8 sps:$4 sm:$0xff]   ;;  %v2850_v51 = vld [vmem:[#allocation2 + $0x2c0] ss:$8 sps:$4 sm:$0xff]   ;;  %v2861_v56 = vld [vmem:[#allocation2 + $0x2f4] ss:$8 sps:$4 sm:$0xff]  }
  0x67   :  { %703 = vmatpush1.bf16.msra.mxu0 %v2741_v18  ;;  %2468 = vmatpush3.bf16.msra.mxu1 %v2869_v59  ;;  %v2813_v18 = vld [vmem:[#allocation2 + $0x1f4] ss:$8 sps:$4 sm:$0xff]   ;;  %v2856_v55 = vld [vmem:[#allocation2 + $0x2e0] ss:$8 sps:$4 sm:$0xff]  }
  0x68   :  { %704 = vmatprep.subr.bf16.mxu0 %v2742_v19  ;;  %2469 = vmatprep.subr.bf16.mxu1 %v2870_v60  ;;  %v2811_v19 = vld [vmem:[#allocation2 + $0x1f0] ss:$8 sps:$4 sm:$0xff]  }
  0x69   :  { %v92_v59 = vld [vmem:[%s3376_s0 + $0x50] sm:$0xff] }
  0x6b   :  { %705 = vmatpush1.bf16.msra.mxu0 %v2744_v20  ;;  %2470 = vmatpush3.bf16.msra.mxu1 %v2871_v62  ;;  %v84_v20 = vld [vmem:[%s3376_s0 + $0x10] sm:$0xff] }
  0x6c   :  { %706 = vmatprep.subr.bf16.mxu0 %v2745_v21  ;;  %2471 = vmatprep.subr.bf16.mxu1 %v2872_v0  ;;  %v90_v21 = vld [vmem:[%s3376_s0 + $0x40] sm:$0xff]  ;;  %v2874_v62 = vld [vmem:[#allocation6 + $0x70] sm:$0xff]   ;;  %v2876_v0 = vld [vmem:[#allocation6 + $0x78] sm:$0xff]  }
  0x6f   :  { %707 = vmatpush1.bf16.msra.mxu0 %v2747_v22  ;;  %v2816_v22 = vld [vmem:[#allocation2 + $0x204] ss:$8 sps:$4 sm:$0xff]  }
  0x70   :  { %708 = vmatprep.subr.bf16.mxu0 %v2748_v23  ;;  %v87_v23 = vld [vmem:[%s3376_s0 + $0x28] sm:$0xff] }
  0x73   :  { %709 = vmatpush1.bf16.msra.mxu0 %v2750_v24  ;;  %v93_v24 = vld [vmem:[%s3376_s0 + $0x58] sm:$0xff] }
  0x74   :  { %710 = vmatprep.subr.bf16.mxu0 %v2751_v25  ;;  %v2814_v25 = vld [vmem:[#allocation2 + $0x200] ss:$8 sps:$4 sm:$0xff]  }
  0x77   :  { %711 = vmatpush1.bf16.msra.mxu0 %v2753_v26  ;;  %v96_v26 = vpack.c.bf16 %v90_v21, %v84_v20 }
  0x78   :  { %712 = vmatprep.subr.bf16.mxu0 %v2754_v27  ;;  %v2819_v27 = vld [vmem:[#allocation2 + $0x214] ss:$8 sps:$4 sm:$0xff]  }
  0x7b   :  { %713 = vmatpush1.bf16.msra.mxu0 %v2756_v28  ;;  %v99_v28 = vpack.c.bf16 %v93_v24, %v87_v23  ;;  %v2878_v24 = vld [vmem:[#allocation7] sm:$0xff]  }
  0x7c   :  { %714 = vmatprep.subr.bf16.mxu0 %v2757_v29  ;;  %v2817_v29 = vld [vmem:[#allocation2 + $0x210] ss:$8 sps:$4 sm:$0xff]  }
  0x7f   :  { %715 = vmatpush1.bf16.msra.mxu0 %v2759_v30  ;;  %v2822_v30 = vld [vmem:[#allocation2 + $0x224] ss:$8 sps:$4 sm:$0xff]  }
  0x80   :  { %716 = vmatprep.subr.bf16.mxu0 %v2760_v31  ;;  %v2820_v31 = vld [vmem:[#allocation2 + $0x220] ss:$8 sps:$4 sm:$0xff]  }
  0x83   :  { %717 = vmatpush1.bf16.msra.mxu0 %v2762_v32  ;;  %v2825_v32 = vld [vmem:[#allocation2 + $0x234] ss:$8 sps:$4 sm:$0xff]  }
  0x84   :  { %718 = vmatprep.subr.bf16.mxu0 %v2763_v33  ;;  %v2823_v33 = vld [vmem:[#allocation2 + $0x230] ss:$8 sps:$4 sm:$0xff]  }
  0x87   :  { %719 = vmatpush1.bf16.msra.mxu0 %v2765_v34  ;;  %v2828_v34 = vld [vmem:[#allocation2 + $0x244] ss:$8 sps:$4 sm:$0xff]  }
  0x88   :  { %731 = vmatprep.subr.bf16.mxu0 %v2768_v35  ;;  %v2826_v35 = vld [vmem:[#allocation2 + $0x240] ss:$8 sps:$4 sm:$0xff]  }
  0x8a   :  { %721 = vmatmul.mubr.bf16.vlgmr.msra.gmra.mrb[0].mxu0 %v94_v40  ;;  %v2837_v40 = vld [vmem:[#allocation2 + $0x274] ss:$8 sps:$4 sm:$0xff]  }
  0x8b   :  { %732 = vmatpush1.bf16.msra.mxu0 %v2766_v41  ;;  %763 = vmatprep.mubr.bf16.mxu0 %v97_v42  ;;  %v2835_v41 = vld [vmem:[#allocation2 + $0x270] ss:$8 sps:$4 sm:$0xff]   ;;  %v2840_v42 = vld [vmem:[#allocation2 + $0x284] ss:$8 sps:$4 sm:$0xff]  }
  0x8c   :  { %733 = vmatprep.subr.bf16.mxu0 %v2771_v43  ;;  %v2838_v43 = vld [vmem:[#allocation2 + $0x280] ss:$8 sps:$4 sm:$0xff]  }
  0x8f   :  { %734 = vmatpush1.bf16.msra.mxu0 %v2769_v44  ;;  %v2843_v44 = vld [vmem:[#allocation2 + $0x294] ss:$8 sps:$4 sm:$0xff]  }
  0x90   :  { %735 = vmatprep.subr.bf16.mxu0 %v2774_v45  ;;  %v2841_v45 = vld [vmem:[#allocation2 + $0x290] ss:$8 sps:$4 sm:$0xff]  }
  0x93   :  { %736 = vmatpush1.bf16.msra.mxu0 %v2772_v47  ;;  %v2844_v47 = vld [vmem:[#allocation2 + $0x2a0] ss:$8 sps:$4 sm:$0xff]  }
  0x94   :  { %737 = vmatprep.subr.bf16.mxu0 %v2777_v49  ;;  %v2847_v49 = vld [vmem:[#allocation2 + $0x2b0] ss:$8 sps:$4 sm:$0xff]  }
  0x97   :  { %738 = vmatpush1.bf16.msra.mxu0 %v2775_v53  ;;  %v2853_v53 = vld [vmem:[#allocation2 + $0x2d0] ss:$8 sps:$4 sm:$0xff]  }
  0x98   :  { %739 = vmatprep.subr.bf16.mxu0 %v2780_v54  ;;  %v2858_v54 = vld [vmem:[#allocation2 + $0x2e4] ss:$8 sps:$4 sm:$0xff]  }
  0x9b   :  { %740 = vmatpush1.bf16.msra.mxu0 %v2778_v57  ;;  %v2859_v57 = vld [vmem:[#allocation2 + $0x2f0] ss:$8 sps:$4 sm:$0xff]  }
  0x9c   :  { %741 = vmatprep.subr.bf16.mxu0 %v2783_v58  ;;  %v86_v58 = vld [vmem:[%s3376_s0 + $0x20] sm:$0xff] }
  0x9d   :  { %v98_v60 = vpack.c.bf16 %v92_v59, %v86_v58 }
  0x9f   :  { %742 = vmatpush1.bf16.msra.mxu0 %v2781_v61  ;;  %v2873_v61 = vld [vmem:[#allocation6 + $0x28] sm:$0xff]  }
  0xa0   :  { %743 = vmatprep.subr.bf16.mxu0 %v2786_v63  ;;  %2472 = vmatpush3.bf16.msra.mxu1 %v2873_v61  ;;  %v2875_v63 = vld [vmem:[#allocation6 + $0x30] sm:$0xff]   ;;  %v2894_v61 = vld [vmem:[#allocation7 + $0x80] sm:$0xff]  }
  0xa1   :  { %2473 = vmatprep.subr.bf16.mxu1 %v2874_v62 }
  0xa3   :  { %744 = vmatpush1.bf16.msra.mxu0 %v2784_v1  ;;  %v2877_v1 = vld [vmem:[#allocation6 + $0x38] sm:$0xff]  }
  0xa4   :  { %745 = vmatprep.subr.bf16.mxu0 %v2789_v2  ;;  %2474 = vmatpush3.bf16.msra.mxu1 %v2875_v63  ;;  %v3116_v2 = vmov 0.0   ;;  %v2895_v63 = vld [vmem:[#allocation7 + $0x88] sm:$0xff]  }
  0xa5   :  { %2475 = vmatprep.subr.bf16.mxu1 %v2876_v0  ;;  %v2896_v0 = vld [vmem:[#allocation7 + $0x90] sm:$0xff]  }
  0xa7   :  { %746 = vmatpush1.bf16.msra.mxu0 %v2787_v3  ;;  %v198_v3 = vlaneseq }
  0xa8   :  { %747 = vmatprep.subr.bf16.mxu0 %v2792_v4  ;;  %2476 = vmatpush3.bf16.msra.mxu1 %v2877_v1  ;;  %v2897_v1 = vld [vmem:[#allocation7 + $0x98] sm:$0xff]  }
  0xa9   :  { %2559 = vmatprep.subr.bf16.mxu1 %v3116_v2  ;;  %v3251_v4 = vshrl.u32 %v198_v3, 7  ;;  %v2898_v3 = vld [vmem:[#allocation7 + $0xa0] sm:$0xff]  }
  0xab   :  { %748 = vmatpush1.bf16.msra.mxu0 %v2790_v5  ;;  %v200_v5 = vsub.s32 0, %v3251_v4 }
  0xac   :  { %749 = vmatprep.subr.bf16.mxu0 %v2795_v6  ;;  %v196_v6 = vld [vmem:[%s3382_s6] ss:$8 sm:$0x3] }
  0xaf   :  { %750 = vmatpush1.bf16.msra.mxu0 %v2793_v7  ;;  %v204_v7 = vsub.s32 1, %v3251_v4  ;;  %v2991_v4 = vld [vmem:[#allocation7 + $0xc8] sm:$0xff]  }
  0xb0   :  { %751 = vmatprep.subr.bf16.mxu0 %v2798_v8  ;;  %v201_v8 = vrot.slane %v196_v6, %v200_v5 }
  0xb3   :  { %752 = vmatpush1.bf16.msra.mxu0 %v2796_v9  ;;  %v205_v9 = vrot.slane %v196_v6, %v204_v7  ;;  %v2899_v6 = vld [vmem:[#allocation7 + $0xa8] sm:$0xff]  }
  0xb4   :  { %753 = vmatprep.subr.bf16.mxu0 %v2801_v10 }
  0xb7   :  { %754 = vmatpush1.bf16.msra.mxu0 %v2799_v11 }
  0xb8   :  { %755 = vmatprep.subr.bf16.mxu0 %v2804_v12 }
  0xbb   :  { %756 = vmatpush1.bf16.msra.mxu0 %v2802_v13 }
  0xbc   :  { %757 = vmatprep.subr.bf16.mxu0 %v2807_v14 }
  0xbf   :  { %758 = vmatpush1.bf16.msra.mxu0 %v2805_v15 }
  0xc0   :  { %759 = vmatprep.subr.bf16.mxu0 %v2810_v16 }
  0xc3   :  { %760 = vmatpush1.bf16.msra.mxu0 %v2808_v17 }
  0xc4   :  { %761 = vmatprep.subr.bf16.mxu0 %v2813_v18 }
  0xc7   :  { %762 = vmatpush1.bf16.msra.mxu0 %v2811_v19 }
  0xc8   :  { %774 = vmatprep.subr.bf16.mxu0 %v2816_v22 }
  0xca   :  { %764 = vmatmul.mubr.bf16.vlgmr.msra.gmra.mrb[0].mxu0 %v96_v26  ;;  %v2880_v26 = vld [vmem:[#allocation7 + $0x10] sm:$0xff]  }
  0xcb   :  { %775 = vmatpush1.bf16.msra.mxu0 %v2814_v25  ;;  %806 = vmatprep.mubr.bf16.mxu0 %v99_v28  ;;  %v2879_v25 = vld [vmem:[#allocation7 + $0x8] sm:$0xff]   ;;  %v2882_v28 = vld [vmem:[#allocation7 + $0x20] sm:$0xff]  }
  0xcc   :  { %776 = vmatprep.subr.bf16.mxu0 %v2819_v27  ;;  %v2881_v27 = vld [vmem:[#allocation7 + $0x18] sm:$0xff]  }
  0xcf   :  { %777 = vmatpush1.bf16.msra.mxu0 %v2817_v29  ;;  %v2883_v29 = vld [vmem:[#allocation7 + $0x28] sm:$0xff]  }
  0xd0   :  { %778 = vmatprep.subr.bf16.mxu0 %v2822_v30  ;;  %v2884_v30 = vld [vmem:[#allocation7 + $0x30] sm:$0xff]  }
  0xd3   :  { %779 = vmatpush1.bf16.msra.mxu0 %v2820_v31  ;;  %v2885_v31 = vld [vmem:[#allocation7 + $0x38] sm:$0xff]  }
  0xd4   :  { %780 = vmatprep.subr.bf16.mxu0 %v2825_v32 }
  0xd7   :  { %781 = vmatpush1.bf16.msra.mxu0 %v2823_v33  ;;  %v855_v33 = vld [vmem:[%s3382_s6 + $0x1] ss:$0 sm:$0xff] }
  0xd8   :  { %782 = vmatprep.subr.bf16.mxu0 %v2828_v34 }
  0xdb   :  { %783 = vmatpush1.bf16.msra.mxu0 %v2826_v35 }
  0xdc   :  { %784 = vmatprep.subr.bf16.mxu0 %v2831_v36 }
  0xdf   :  { %785 = vmatpush1.bf16.msra.mxu0 %v2829_v37 }
  0xe0   :  { %786 = vmatprep.subr.bf16.mxu0 %v2834_v38 }
  0xe3   :  { %787 = vmatpush1.bf16.msra.mxu0 %v2832_v39 }
  0xe4   :  { %788 = vmatprep.subr.bf16.mxu0 %v2837_v40 }
  0xe7   :  { %789 = vmatpush1.bf16.msra.mxu0 %v2835_v41 }
  0xe8   :  { %790 = vmatprep.subr.bf16.mxu0 %v2840_v42 }
  0xeb   :  { %791 = vmatpush1.bf16.msra.mxu0 %v2838_v43  ;;  %v2886_v43 = vld [vmem:[#allocation7 + $0x40] sm:$0xff]  }
  0xec   :  { %792 = vmatprep.subr.bf16.mxu0 %v2843_v44 }
  0xef   :  { %793 = vmatpush1.bf16.msra.mxu0 %v2841_v45  ;;  %v2887_v45 = vld [vmem:[#allocation7 + $0x48] sm:$0xff]  }
  0xf0   :  { %794 = vmatprep.subr.bf16.mxu0 %v2846_v46  ;;  %v2888_v46 = vld [vmem:[#allocation7 + $0x50] sm:$0xff]  }
  0xf3   :  { %795 = vmatpush1.bf16.msra.mxu0 %v2844_v47  ;;  %v2889_v47 = vld [vmem:[#allocation7 + $0x58] sm:$0xff]  }
  0xf4   :  { %796 = vmatprep.subr.bf16.mxu0 %v2849_v48  ;;  %v2890_v48 = vld [vmem:[#allocation7 + $0x60] sm:$0xff]  }
  0xf7   :  { %797 = vmatpush1.bf16.msra.mxu0 %v2847_v49  ;;  %v2891_v49 = vld [vmem:[#allocation7 + $0x68] sm:$0xff]  }
  0xf8   :  { %798 = vmatprep.subr.bf16.mxu0 %v2852_v50  ;;  %v2892_v50 = vld [vmem:[#allocation7 + $0x70] sm:$0xff]  }
  0xfb   :  { %799 = vmatpush1.bf16.msra.mxu0 %v2850_v51  ;;  %v2893_v51 = vld [vmem:[#allocation7 + $0x78] sm:$0xff]  }
  0xfc   :  { %800 = vmatprep.subr.bf16.mxu0 %v2855_v52  ;;  %v1012_v52 = vld [vmem:[%s3382_s6 + $0x2] ss:$0 sm:$0xff] }
  0xff   :  { %801 = vmatpush1.bf16.msra.mxu0 %v2853_v53 }
 0x100   :  { %802 = vmatprep.subr.bf16.mxu0 %v2858_v54 }
 0x103   :  { %803 = vmatpush1.bf16.msra.mxu0 %v2856_v55 }
 0x104   :  { %804 = vmatprep.subr.bf16.mxu0 %v2861_v56 }
 0x107   :  { %805 = vmatpush1.bf16.msra.mxu0 %v2859_v57 }
 0x10a   :  { %807 = vmatmul.mubr.bf16.vlgmr.msra.gmra.mrb[0].mxu0 %v98_v60 }
 0x1dd   :  { %v808_v10 = vpop.f32.mrb[0].mxu0 }
 0x1de   :  { %v2679_v11 = vadd.f32 %v808_v10, %v201_v8  ;;  %v810_v12 = vpop.f32.mrb[1].mxu0  ;;  %v2904_v10 = vld [vmem:[#allocation4 + $0x4] ss:$8 sps:$4 sm:$0xff]  }
 0x1df   :  { %v2680_v13 = vadd.f32 %v810_v12, %v205_v9  ;;  %v812_v14 = vpop.f32.mrb[2].mxu0  ;;  %v2975_v12 = vld [vmem:[#allocation6 + $0x80] sm:$0xff]  }
 0x1e0   :  { %v2681_v15 = vadd.f32 %v812_v14, %v201_v8  ;;  %v814_v16 = vpop.f32.mrb[3].mxu0  ;;  %v817_v18 = vmax.f32 %v2679_v11, 0.0  ;;  %v2900_v8 = vld [vmem:[#allocation7 + $0xb0] sm:$0xff]   ;;  %v2974_v11 = vld [vmem:[#allocation6 + $0xc0] sm:$0xff]   ;;  %v2977_v14 = vld [vmem:[#allocation6 + $0x88] sm:$0xff]  }
 0x1e1   :  { %v2682_v17 = vadd.f32 %v814_v16, %v205_v9  ;;  %v818_v20 = vmax.f32 %v2680_v13, 0.0  ;;  %v2901_v9 = vld [vmem:[#allocation7 + $0xb8] sm:$0xff]   ;;  %v2976_v13 = vld [vmem:[#allocation6 + $0xc8] sm:$0xff]   ;;  %2510 = vmatprep.subr.bf16.mxu0 %v2974_v11  ;;  %v2979_v16 = vld [vmem:[#allocation6 + $0x90] sm:$0xff]  }
 0x1e2   :  { %v819_v19 = vmax.f32 %v2681_v15, 0.0  ;;  %2511 = vmatpush3.bf16.msra.mxu0 %v2975_v12  ;;  %v2978_v15 = vld [vmem:[#allocation6 + $0xd0] sm:$0xff]  }
 0x1e3   :  { %v820_v21 = vmax.f32 %v2682_v17, 0.0  ;;  %2512 = vmatprep.subr.bf16.mxu0 %v2976_v13  ;;  %v2980_v17 = vld [vmem:[#allocation6 + $0xd8] sm:$0xff]   ;;  %v3118_v13 = vmov 0  }
 0x1e4   :  { %v821_v22 = vpack.c.bf16 %v819_v19, %v817_v18  ;;  %v2981_v18 = vld [vmem:[#allocation6 + $0x98] sm:$0xff]   ;;  %v2982_v19 = vld [vmem:[#allocation6 + $0xe0] sm:$0xff]  }
 0x1e5   :  { %v822_v23 = vpack.c.bf16 %v820_v21, %v818_v20  ;;  %v2983_v20 = vld [vmem:[#allocation6 + $0xa0] sm:$0xff]   ;;  %v2984_v21 = vld [vmem:[#allocation6 + $0xe8] sm:$0xff]   ;;  %v2955_v11 = vld [vmem:[#allocation4 + $0x114] ss:$8 sps:$4 sm:$0xff]  }
 0x1e6   :  { %2513 = vmatpush3.bf16.msra.mxu0 %v2977_v14  ;;  %v2953_v12 = vld [vmem:[#allocation4 + $0x110] ss:$8 sps:$4 sm:$0xff]   ;;  %v2958_v14 = vld [vmem:[#allocation4 + $0x124] ss:$8 sps:$4 sm:$0xff]  }
 0x1e7   :  { %984 = vmatprep.mubr.bf16.mxu1 %v822_v23  ;;  %2514 = vmatprep.subr.bf16.mxu0 %v2978_v15  ;;  %v2956_v15 = vld [vmem:[#allocation4 + $0x120] ss:$8 sps:$4 sm:$0xff]  }
 0x1e8   :  { %985 = vmatmul.mubr.bf16.vlgmr.msra.gmra.mrb[0].mxu1 %v821_v22  ;;  %v1122_v22 = vld [vmem:[%s3382_s6 + $0x3] ss:$0 sm:$0xff] }
 0x1e9   :  { %2560 = vmatpush3.bf16.msra.mxu1 %v2878_v24  ;;  %2575 = vmatprep.mubr.msk.bf16.mxu1 %vm3117_vm0, %v3116_v2 }
 0x1ea   :  { %2561 = vmatprep.subr.bf16.mxu1 %v3116_v2  ;;  %2515 = vmatpush3.bf16.msra.mxu0 %v2979_v16  ;;  %v2961_v16 = vld [vmem:[#allocation4 + $0x134] ss:$8 sps:$4 sm:$0xff]  }
 0x1eb   :  { %2516 = vmatprep.subr.bf16.mxu0 %v2980_v17  ;;  %v2959_v17 = vld [vmem:[#allocation4 + $0x130] ss:$8 sps:$4 sm:$0xff]  }
 0x1ed   :  { %2562 = vmatpush3.bf16.msra.mxu1 %v2879_v25 }
 0x1ee   :  { %2563 = vmatprep.subr.bf16.mxu1 %v3116_v2  ;;  %2517 = vmatpush3.bf16.msra.mxu0 %v2981_v18  ;;  %v2964_v18 = vld [vmem:[#allocation4 + $0x144] ss:$8 sps:$4 sm:$0xff]  }
 0x1ef   :  { %2518 = vmatprep.subr.bf16.mxu0 %v2982_v19  ;;  %v2962_v19 = vld [vmem:[#allocation4 + $0x140] ss:$8 sps:$4 sm:$0xff]  }
 0x1f1   :  { %2564 = vmatpush3.bf16.msra.mxu1 %v2880_v26 }
 0x1f2   :  { %2565 = vmatprep.subr.bf16.mxu1 %v3116_v2  ;;  %2519 = vmatpush3.bf16.msra.mxu0 %v2983_v20  ;;  %v2967_v20 = vld [vmem:[#allocation4 + $0x154] ss:$8 sps:$4 sm:$0xff]  }
 0x1f3   :  { %2520 = vmatprep.subr.bf16.mxu0 %v2984_v21  ;;  %v2965_v21 = vld [vmem:[#allocation4 + $0x150] ss:$8 sps:$4 sm:$0xff]  }
 0x1f5   :  { %2566 = vmatpush3.bf16.msra.mxu1 %v2881_v27 }
 0x1f6   :  { %2567 = vmatprep.subr.bf16.mxu1 %v3116_v2 }
 0x1f9   :  { %2568 = vmatpush3.bf16.msra.mxu1 %v2882_v28 }
 0x1fa   :  { %2569 = vmatprep.subr.bf16.mxu1 %v3116_v2 }
 0x1fd   :  { %2570 = vmatpush3.bf16.msra.mxu1 %v2883_v29  ;;  %v1323_v29 = vld [vmem:[%s3377_s1 + $0x8] sm:$0xff] }
 0x1fe   :  { %2571 = vmatprep.subr.bf16.mxu1 %v3116_v2 }
 0x201   :  { %2572 = vmatpush3.bf16.msra.mxu1 %v2884_v30  ;;  %v1326_v30 = vld [vmem:[%s3377_s1 + $0x20] sm:$0xff] }
 0x202   :  { %2573 = vmatprep.subr.bf16.mxu1 %v3116_v2 }
 0x205   :  { %2574 = vmatpush3.bf16.msra.mxu1 %v2885_v31 }
 0x206   :  { %2579 = vmatprep.subr.bf16.mxu1 %v3116_v2 }
 0x2bb   :  { %v2477_v32 = vpop.f32.mrb[0].mxu1 }
 0x2bc   :  { %v2478_v34 = vpop.f32.mrb[1].mxu1 }
 0x2bd   :  { %v2479_v35 = vadd.f32 %v2478_v34, %v2477_v32  ;;  %v2480_v36 = vpop.f32.mrb[2].mxu1  ;;  %v1329_v34 = vpack.c.bf16 %v1326_v30, %v1323_v29  ;;  %v2985_v29 = vld [vmem:[#allocation6 + $0xa8] sm:$0xff]   ;;  %v2986_v30 = vld [vmem:[#allocation6 + $0xf0] sm:$0xff]  }
 0x2be   :  { %v2481_v37 = vpop.f32.mrb[3].mxu1  ;;  %2521 = vmatpush3.bf16.msra.mxu0 %v2985_v29  ;;  %v3009_v29 = vld [vmem:[#allocation7 + $0x158] sm:$0xff]  }
 0x2bf   :  { %v987_v38 = vadd.f32 %v2479_v35, %v855_v33  ;;  %v2482_v39 = vadd.f32 %v2481_v37, %v2480_v36  ;;  %v2907_v36 = vld [vmem:[#allocation4 + $0x14] ss:$8 sps:$4 sm:$0xff]   ;;  %v2905_v37 = vld [vmem:[#allocation4 + $0x10] ss:$8 sps:$4 sm:$0xff]   ;;  %2522 = vmatprep.subr.bf16.mxu0 %v2986_v30  ;;  %v3010_v30 = vld [vmem:[#allocation7 + $0x160] sm:$0xff]  }
 0x2c1   :  { %v990_v40 = vadd.f32 %v2482_v39, %v855_v33  ;;  %v993_v41 = vmax.f32 %v987_v38, 0.0  ;;  %v2902_v33 = vld [vmem:[#allocation4] ss:$8 sps:$4 sm:$0xff]   ;;  %v2910_v38 = vld [vmem:[#allocation4 + $0x24] ss:$8 sps:$4 sm:$0xff]  }
 0x2c2   :  { %v2908_v39 = vld [vmem:[#allocation4 + $0x20] ss:$8 sps:$4 sm:$0xff]  }
 0x2c3   :  { %v994_v42 = vmax.f32 %v990_v40, 0.0  ;;  %v2913_v40 = vld [vmem:[#allocation4 + $0x34] ss:$8 sps:$4 sm:$0xff]  }
 0x2c5   :  { %v995_v44 = vpack.c.bf16 %v994_v42, %v993_v41  ;;  %v2911_v41 = vld [vmem:[#allocation4 + $0x30] ss:$8 sps:$4 sm:$0xff]   ;;  %v2916_v42 = vld [vmem:[#allocation4 + $0x44] ss:$8 sps:$4 sm:$0xff]  }
 0x2c7   :  { %2576 = vmatmul.mubr.bf16.vlgmr.msra.gmra.mrb[4].mxu1 %v995_v44  ;;  %v2919_v44 = vld [vmem:[#allocation4 + $0x54] ss:$8 sps:$4 sm:$0xff]  }
 0x2c8   :  { %2580 = vmatpush3.bf16.msra.mxu1 %v2886_v43  ;;  %2595 = vmatprep.mubr.msk.bf16.mxu1 %vm3117_vm0, %v3116_v2  ;;  %v2914_v43 = vld [vmem:[#allocation4 + $0x40] ss:$8 sps:$4 sm:$0xff]  }
 0x2c9   :  { %2581 = vmatprep.subr.bf16.mxu1 %v3116_v2 }
 0x2cc   :  { %2582 = vmatpush3.bf16.msra.mxu1 %v2887_v45  ;;  %v2917_v45 = vld [vmem:[#allocation4 + $0x50] ss:$8 sps:$4 sm:$0xff]  }
 0x2cd   :  { %2583 = vmatprep.subr.bf16.mxu1 %v3116_v2 }
 0x2d0   :  { %2584 = vmatpush3.bf16.msra.mxu1 %v2888_v46  ;;  %v2922_v46 = vld [vmem:[#allocation4 + $0x64] ss:$8 sps:$4 sm:$0xff]  }
 0x2d1   :  { %2585 = vmatprep.subr.bf16.mxu1 %v3116_v2 }
 0x2d4   :  { %2586 = vmatpush3.bf16.msra.mxu1 %v2889_v47  ;;  %v2920_v47 = vld [vmem:[#allocation4 + $0x60] ss:$8 sps:$4 sm:$0xff]  }
 0x2d5   :  { %2587 = vmatprep.subr.bf16.mxu1 %v3116_v2 }
 0x2d8   :  { %2588 = vmatpush3.bf16.msra.mxu1 %v2890_v48  ;;  %v2925_v48 = vld [vmem:[#allocation4 + $0x74] ss:$8 sps:$4 sm:$0xff]  }
 0x2d9   :  { %2589 = vmatprep.subr.bf16.mxu1 %v3116_v2 }
 0x2dc   :  { %2590 = vmatpush3.bf16.msra.mxu1 %v2891_v49  ;;  %v2923_v49 = vld [vmem:[#allocation4 + $0x70] ss:$8 sps:$4 sm:$0xff]  }
 0x2dd   :  { %2591 = vmatprep.subr.bf16.mxu1 %v3116_v2 }
 0x2e0   :  { %2592 = vmatpush3.bf16.msra.mxu1 %v2892_v50  ;;  %v2928_v50 = vld [vmem:[#allocation4 + $0x84] ss:$8 sps:$4 sm:$0xff]  }
 0x2e1   :  { %2593 = vmatprep.subr.bf16.mxu1 %v3116_v2 }
 0x2e4   :  { %2594 = vmatpush3.bf16.msra.mxu1 %v2893_v51  ;;  %v2926_v51 = vld [vmem:[#allocation4 + $0x80] ss:$8 sps:$4 sm:$0xff]  }
 0x2e5   :  { %2599 = vmatprep.subr.bf16.mxu1 %v3116_v2 }
 0x39a   :  { %v1095_v53 = vpop.f32.mrb[4].mxu1 }
 0x39b   :  { %v1096_v54 = vadd.f32 %v1095_v53, %v1012_v52  ;;  %v2577_v55 = vpop.f32.mrb[5].mxu1  ;;  %v2929_v53 = vld [vmem:[#allocation4 + $0x90] ss:$8 sps:$4 sm:$0xff]  }
 0x39c   :  { %v1098_v56 = vpop.f32.mrb[6].mxu1  ;;  %v2932_v55 = vld [vmem:[#allocation4 + $0xa0] ss:$8 sps:$4 sm:$0xff]  }
 0x39d   :  { %v1099_v57 = vadd.f32 %v1098_v56, %v1012_v52  ;;  %v2578_v58 = vpop.f32.mrb[7].mxu1  ;;  %v1102_v59 = vmax.f32 %v1096_v54, 0.0  ;;  %v2931_v52 = vld [vmem:[#allocation4 + $0x94] ss:$8 sps:$4 sm:$0xff]   ;;  %v2934_v54 = vld [vmem:[#allocation4 + $0xa4] ss:$8 sps:$4 sm:$0xff]  }
 0x39e   :  { %v2937_v56 = vld [vmem:[#allocation4 + $0xb4] ss:$8 sps:$4 sm:$0xff]   ;;  %v2940_v58 = vld [vmem:[#allocation4 + $0xc4] ss:$8 sps:$4 sm:$0xff]  }
 0x39f   :  { %v1103_v60 = vmax.f32 %v1099_v57, 0.0  ;;  %v2935_v57 = vld [vmem:[#allocation4 + $0xb0] ss:$8 sps:$4 sm:$0xff]  }
 0x3a1   :  { %v1104_v62 = vpack.c.bf16 %v1103_v60, %v1102_v59  ;;  %v2938_v59 = vld [vmem:[#allocation4 + $0xc0] ss:$8 sps:$4 sm:$0xff]   ;;  %v2943_v60 = vld [vmem:[#allocation4 + $0xd4] ss:$8 sps:$4 sm:$0xff]  }
 0x3a3   :  { %2596 = vmatmul.mubr.bf16.vlgmr.msra.gmra.mrb[8].mxu1 %v1104_v62  ;;  %v2946_v62 = vld [vmem:[#allocation4 + $0xe4] ss:$8 sps:$4 sm:$0xff]  }
 0x3a4   :  { %2600 = vmatpush3.bf16.msra.mxu1 %v2894_v61  ;;  %2615 = vmatprep.mubr.msk.bf16.mxu1 %vm3117_vm0, %v3116_v2  ;;  %v2941_v61 = vld [vmem:[#allocation4 + $0xd0] ss:$8 sps:$4 sm:$0xff]  }
 0x3a5   :  { %2601 = vmatprep.subr.bf16.mxu1 %v3116_v2 }
 0x3a8   :  { %2602 = vmatpush3.bf16.msra.mxu1 %v2895_v63  ;;  %v2944_v63 = vld [vmem:[#allocation4 + $0xe0] ss:$8 sps:$4 sm:$0xff]  }
 0x3a9   :  { %2603 = vmatprep.subr.bf16.mxu1 %v3116_v2 }
 0x3ac   :  { %2604 = vmatpush3.bf16.msra.mxu1 %v2896_v0  ;;  %v2949_v0 = vld [vmem:[#allocation4 + $0xf4] ss:$8 sps:$4 sm:$0xff]  }
 0x3ad   :  { %2605 = vmatprep.subr.bf16.mxu1 %v3116_v2 }
 0x3b0   :  { %2606 = vmatpush3.bf16.msra.mxu1 %v2897_v1  ;;  %v2947_v1 = vld [vmem:[#allocation4 + $0xf0] ss:$8 sps:$4 sm:$0xff]  }
 0x3b1   :  { %2607 = vmatprep.subr.bf16.mxu1 %v3116_v2 }
 0x3b4   :  { %2608 = vmatpush3.bf16.msra.mxu1 %v2898_v3  ;;  %v1322_v3 = vld [vmem:[%s3377_s1] sm:$0xff] }
 0x3b5   :  { %2609 = vmatprep.subr.bf16.mxu1 %v3116_v2 }
 0x3b8   :  { %2610 = vmatpush3.bf16.msra.mxu1 %v2899_v6  ;;  %v1325_v6 = vld [vmem:[%s3377_s1 + $0x18] sm:$0xff] }
 0x3b9   :  { %2611 = vmatprep.subr.bf16.mxu1 %v3116_v2 }
 0x3bc   :  { %2612 = vmatpush3.bf16.msra.mxu1 %v2900_v8  ;;  %v2952_v8 = vld [vmem:[#allocation4 + $0x104] ss:$8 sps:$4 sm:$0xff]  }
 0x3bd   :  { %2613 = vmatprep.subr.bf16.mxu1 %v3116_v2 }
 0x3c0   :  { %2614 = vmatpush3.bf16.msra.mxu1 %v2901_v9  ;;  %v1328_v9 = vpack.c.bf16 %v1325_v6, %v1322_v3 }
 0x3c1   :  { %1632 = vmatprep.subr.bf16.mxu1 %v2904_v10  ;;  %v2950_v10 = vld [vmem:[#allocation4 + $0x100] ss:$8 sps:$4 sm:$0xff]  }
 0x476   :  { %v1205_v23 = vpop.f32.mrb[8].mxu1 }
 0x477   :  { %v1206_v24 = vadd.f32 %v1205_v23, %v1122_v22  ;;  %v2597_v25 = vpop.f32.mrb[9].mxu1  ;;  %v2968_v23 = vld [vmem:[#allocation4 + $0x160] ss:$8 sps:$4 sm:$0xff]  }
 0x478   :  { %v1208_v26 = vpop.f32.mrb[10].mxu1  ;;  %v2971_v25 = vld [vmem:[#allocation4 + $0x170] ss:$8 sps:$4 sm:$0xff]  }
 0x479   :  { %v1209_v27 = vadd.f32 %v1208_v26, %v1122_v22  ;;  %v2598_v28 = vpop.f32.mrb[11].mxu1  ;;  %v1212_v31 = vmax.f32 %v1206_v24, 0.0  ;;  %v2970_v22 = vld [vmem:[#allocation4 + $0x164] ss:$8 sps:$4 sm:$0xff]   ;;  %v2973_v24 = vld [vmem:[#allocation4 + $0x174] ss:$8 sps:$4 sm:$0xff]  }
 0x47a   :  { %v1324_v26 = vld [vmem:[%s3377_s1 + $0x10] sm:$0xff] }
 0x47b   :  { %v1213_v32 = vmax.f32 %v1209_v27, 0.0  ;;  %v1327_v27 = vld [vmem:[%s3377_s1 + $0x28] sm:$0xff] }
 0x47c   :  { %v1330_v28 = vpack.c.bf16 %v1327_v27, %v1324_v26  ;;  %v3007_v27 = vld [vmem:[#allocation7 + $0x148] sm:$0xff]  }
 0x47d   :  { %v1214_v35 = vpack.c.bf16 %v1213_v32, %v1212_v31  ;;  %v2987_v31 = vld [vmem:[#allocation6 + $0xb0] sm:$0xff]   ;;  %v2988_v32 = vld [vmem:[#allocation6 + $0xf8] sm:$0xff]  }
 0x47e   :  { %2523 = vmatpush3.bf16.msra.mxu0 %v2987_v31  ;;  %v3011_v31 = vld [vmem:[#allocation7 + $0x168] sm:$0xff]  }
 0x47f   :  { %2616 = vmatmul.mubr.bf16.vlgmr.msra.gmra.mrb[12].mxu1 %v1214_v35  ;;  %2524 = vmatprep.subr.bf16.mxu0 %v2988_v32  ;;  %v3012_v32 = vld [vmem:[#allocation7 + $0x170] sm:$0xff]  }
 0x480   :  { %1633 = vmatpush1.bf16.msra.mxu1 %v2902_v33  ;;  %1664 = vmatprep.mubr.bf16.mxu1 %v1329_v34  ;;  %v2989_v33 = vld [vmem:[#allocation6 + $0xb8] sm:$0xff]   ;;  %v2372_v34 = vld [vmem:[%s3382_s6 + $0x5] ss:$8 sm:$0x3] }
 0x481   :  { %1634 = vmatprep.subr.bf16.mxu1 %v2907_v36  ;;  %v1385_v35 = vrot.slane %v2372_v34, %v200_v5  ;;  %v1389_v36 = vrot.slane %v2372_v34, %v204_v7  ;;  %v2992_v5 = vld [vmem:[#allocation7 + $0xd0] sm:$0xff]   ;;  %v2993_v7 = vld [vmem:[#allocation7 + $0xd8] sm:$0xff]  }
 0x482   :  { %2525 = vmatpush3.bf16.msra.mxu0 %v2989_v33  ;;  %v3013_v33 = vld [vmem:[#allocation7 + $0x178] sm:$0xff]   ;;  %v2025_v34 = vld [vmem:[%s3382_s6 + $0x10] ss:$0 sm:$0xff] }
 0x483   :  { %2619 = vmatprep.subr.bf16.mxu0 %v3116_v2 }
 0x484   :  { %1635 = vmatpush1.bf16.msra.mxu1 %v2905_v37 }
 0x485   :  { %1636 = vmatprep.subr.bf16.mxu1 %v2910_v38 }
 0x488   :  { %1637 = vmatpush1.bf16.msra.mxu1 %v2908_v39 }
 0x489   :  { %1638 = vmatprep.subr.bf16.mxu1 %v2913_v40 }
 0x48c   :  { %1639 = vmatpush1.bf16.msra.mxu1 %v2911_v41 }
 0x48d   :  { %1640 = vmatprep.subr.bf16.mxu1 %v2916_v42 }
 0x490   :  { %1641 = vmatpush1.bf16.msra.mxu1 %v2914_v43 }
 0x491   :  { %1642 = vmatprep.subr.bf16.mxu1 %v2919_v44 }
 0x494   :  { %1643 = vmatpush1.bf16.msra.mxu1 %v2917_v45 }
 0x495   :  { %1644 = vmatprep.subr.bf16.mxu1 %v2922_v46 }
 0x498   :  { %1645 = vmatpush1.bf16.msra.mxu1 %v2920_v47 }
 0x499   :  { %1646 = vmatprep.subr.bf16.mxu1 %v2925_v48 }
 0x49c   :  { %1647 = vmatpush1.bf16.msra.mxu1 %v2923_v49 }
 0x49d   :  { %1648 = vmatprep.subr.bf16.mxu1 %v2928_v50 }
 0x4a0   :  { %1649 = vmatpush1.bf16.msra.mxu1 %v2926_v51  ;;  %v2990_v51 = vld [vmem:[#allocation7 + $0xc0] sm:$0xff]  }
 0x4a1   :  { %1650 = vmatprep.subr.bf16.mxu1 %v2931_v52  ;;  %v2994_v52 = vld [vmem:[#allocation7 + $0xe0] sm:$0xff]  }
 0x4a4   :  { %1651 = vmatpush1.bf16.msra.mxu1 %v2929_v53  ;;  %v2995_v53 = vld [vmem:[#allocation7 + $0xe8] sm:$0xff]  }
 0x4a5   :  { %1652 = vmatprep.subr.bf16.mxu1 %v2934_v54  ;;  %v2996_v54 = vld [vmem:[#allocation7 + $0xf0] sm:$0xff]  }
 0x4a8   :  { %1653 = vmatpush1.bf16.msra.mxu1 %v2932_v55  ;;  %v2997_v55 = vld [vmem:[#allocation7 + $0xf8] sm:$0xff]  }
 0x4a9   :  { %1654 = vmatprep.subr.bf16.mxu1 %v2937_v56  ;;  %v2998_v56 = vld [vmem:[#allocation7 + $0x100] sm:$0xff]  }
 0x4ac   :  { %1655 = vmatpush1.bf16.msra.mxu1 %v2935_v57  ;;  %v2999_v57 = vld [vmem:[#allocation7 + $0x108] sm:$0xff]  }
 0x4ad   :  { %1656 = vmatprep.subr.bf16.mxu1 %v2940_v58  ;;  %v3000_v58 = vld [vmem:[#allocation7 + $0x110] sm:$0xff]  }
 0x4b0   :  { %1657 = vmatpush1.bf16.msra.mxu1 %v2938_v59  ;;  %v3001_v59 = vld [vmem:[#allocation7 + $0x118] sm:$0xff]  }
 0x4b1   :  { %1658 = vmatprep.subr.bf16.mxu1 %v2943_v60  ;;  %v3002_v60 = vld [vmem:[#allocation7 + $0x120] sm:$0xff]  }
 0x4b4   :  { %1659 = vmatpush1.bf16.msra.mxu1 %v2941_v61  ;;  %v3003_v61 = vld [vmem:[#allocation7 + $0x128] sm:$0xff]  }
 0x4b5   :  { %1660 = vmatprep.subr.bf16.mxu1 %v2946_v62 }
 0x4b8   :  { %1661 = vmatpush1.bf16.msra.mxu1 %v2944_v63  ;;  %v1757_v63 = vld [vmem:[%s3382_s6 + $0x6] ss:$0 sm:$0xff] }
 0x4b9   :  { %1662 = vmatprep.subr.bf16.mxu1 %v2949_v0 }
 0x4bc   :  { %1663 = vmatpush1.bf16.msra.mxu1 %v2947_v1 }
 0x4bd   :  { %1675 = vmatprep.subr.bf16.mxu1 %v2952_v8 }
 0x4bf   :  { %1665 = vmatmul.mubr.bf16.vlgmr.msra.gmra.mrb[16].mxu1 %v1328_v9 }
 0x4c0   :  { %1676 = vmatpush1.bf16.msra.mxu1 %v2950_v10  ;;  %1707 = vmatprep.mubr.bf16.mxu1 %v3118_v13 }
 0x4c1   :  { %1677 = vmatprep.subr.bf16.mxu1 %v2955_v11 }
 0x4c4   :  { %1678 = vmatpush1.bf16.msra.mxu1 %v2953_v12 }
 0x4c5   :  { %1679 = vmatprep.subr.bf16.mxu1 %v2958_v14  ;;  %v3004_v14 = vld [vmem:[#allocation7 + $0x130] sm:$0xff]  }
 0x4c8   :  { %1680 = vmatpush1.bf16.msra.mxu1 %v2956_v15  ;;  %v3005_v15 = vld [vmem:[#allocation7 + $0x138] sm:$0xff]  }
 0x4c9   :  { %1681 = vmatprep.subr.bf16.mxu1 %v2961_v16  ;;  %v1915_v16 = vld [vmem:[%s3382_s6 + $0x7] ss:$0 sm:$0xff] }
 0x4cc   :  { %1682 = vmatpush1.bf16.msra.mxu1 %v2959_v17 }
 0x4cd   :  { %1683 = vmatprep.subr.bf16.mxu1 %v2964_v18 }
 0x4d0   :  { %1684 = vmatpush1.bf16.msra.mxu1 %v2962_v19 }
 0x4d1   :  { %1685 = vmatprep.subr.bf16.mxu1 %v2967_v20 }
 0x4d4   :  { %1686 = vmatpush1.bf16.msra.mxu1 %v2965_v21 }
 0x4d5   :  { %1687 = vmatprep.subr.bf16.mxu1 %v2970_v22 }
 0x4d8   :  { %1688 = vmatpush1.bf16.msra.mxu1 %v2968_v23 }
 0x4d9   :  { %1689 = vmatprep.subr.bf16.mxu1 %v2973_v24 }
 0x4dc   :  { %1690 = vmatpush1.bf16.msra.mxu1 %v2971_v25  ;;  %v3006_v25 = vld [vmem:[#allocation7 + $0x140] sm:$0xff]  }
 0x4dd   :  { %2639 = vmatprep.subr.bf16.mxu1 %v3116_v2 }
 0x4df   :  { %1708 = vmatmul.mubr.bf16.vlgmr.msra.gmra.mrb[16].mxu1 %v1330_v28  ;;  %v3008_v28 = vld [vmem:[#allocation7 + $0x150] sm:$0xff]  }
 0x4e0   :  { %2655 = vmatprep.mubr.msk.bf16.mxu1 %vm3117_vm0, %v3116_v2  ;;  %2640 = vmatpush3.bf16.msra.mxu1 %v2998_v56 }
 0x4e1   :  { %2641 = vmatprep.subr.bf16.mxu1 %v3116_v2 }
 0x4e4   :  { %2642 = vmatpush3.bf16.msra.mxu1 %v2999_v57 }
 0x4e5   :  { %2643 = vmatprep.subr.bf16.mxu1 %v3116_v2 }
 0x4e8   :  { %2644 = vmatpush3.bf16.msra.mxu1 %v3000_v58 }
 0x4e9   :  { %2645 = vmatprep.subr.bf16.mxu1 %v3116_v2 }
 0x4ec   :  { %2646 = vmatpush3.bf16.msra.mxu1 %v3001_v59 }
 0x4ed   :  { %2647 = vmatprep.subr.bf16.mxu1 %v3116_v2 }
 0x4f0   :  { %2648 = vmatpush3.bf16.msra.mxu1 %v3002_v60 }
 0x4f1   :  { %2649 = vmatprep.subr.bf16.mxu1 %v3116_v2 }
 0x4f4   :  { %2650 = vmatpush3.bf16.msra.mxu1 %v3003_v61 }
 0x4f5   :  { %2651 = vmatprep.subr.bf16.mxu1 %v3116_v2 }
 0x4f8   :  { %2652 = vmatpush3.bf16.msra.mxu1 %v3004_v14 }
 0x4f9   :  { %2653 = vmatprep.subr.bf16.mxu1 %v3116_v2 }
 0x4fc   :  { %2654 = vmatpush3.bf16.msra.mxu1 %v3005_v15 }
 0x4fd   :  { %2659 = vmatprep.subr.bf16.mxu1 %v3116_v2 }
 0x5b2   :  { %v1709_v37 = vpop.f32.mrb[16].mxu1 }
 0x5b3   :  { %v2687_v38 = vadd.f32 %v1709_v37, %v1385_v35  ;;  %v1711_v39 = vpop.f32.mrb[17].mxu1 }
 0x5b4   :  { %v2688_v40 = vadd.f32 %v1711_v39, %v1389_v36  ;;  %v1713_v41 = vpop.f32.mrb[18].mxu1 }
 0x5b5   :  { %v2689_v42 = vadd.f32 %v1713_v41, %v1385_v35  ;;  %v1715_v43 = vpop.f32.mrb[19].mxu1  ;;  %v1718_v45 = vmax.f32 %v2687_v38, 0.0 }
 0x5b6   :  { %v2690_v44 = vadd.f32 %v1715_v43, %v1389_v36  ;;  %v1719_v47 = vmax.f32 %v2688_v40, 0.0 }
 0x5b7   :  { %v1720_v46 = vmax.f32 %v2689_v42, 0.0 }
 0x5b8   :  { %v1721_v48 = vmax.f32 %v2690_v44, 0.0  ;;  %v2135_v44 = vld [vmem:[%s3382_s6 + $0x11] ss:$0 sm:$0xff] }
 0x5b9   :  { %v1722_v49 = vpack.c.bf16 %v1720_v46, %v1718_v45 }
 0x5ba   :  { %v1723_v50 = vpack.c.bf16 %v1721_v48, %v1719_v47 }
 0x5bc   :  { %1886 = vmatprep.mubr.bf16.mxu0 %v1723_v50 }
 0x5bd   :  { %1887 = vmatmul.mubr.bf16.vlgmr.msra.gmra.mrb[4].mxu0 %v1722_v49 }
 0x5be   :  { %2620 = vmatpush3.bf16.msra.mxu0 %v2990_v51  ;;  %2635 = vmatprep.mubr.msk.bf16.mxu0 %vm3117_vm0, %v3116_v2 }
 0x5bf   :  { %2621 = vmatprep.subr.bf16.mxu0 %v3116_v2 }
 0x5c2   :  { %2622 = vmatpush3.bf16.msra.mxu0 %v2991_v4 }
 0x5c3   :  { %2623 = vmatprep.subr.bf16.mxu0 %v3116_v2 }
 0x5c6   :  { %2624 = vmatpush3.bf16.msra.mxu0 %v2992_v5 }
 0x5c7   :  { %2625 = vmatprep.subr.bf16.mxu0 %v3116_v2 }
 0x5ca   :  { %2626 = vmatpush3.bf16.msra.mxu0 %v2993_v7 }
 0x5cb   :  { %2627 = vmatprep.subr.bf16.mxu0 %v3116_v2 }
 0x5ce   :  { %2628 = vmatpush3.bf16.msra.mxu0 %v2994_v52 }
 0x5cf   :  { %2629 = vmatprep.subr.bf16.mxu0 %v3116_v2 }
 0x5d2   :  { %2630 = vmatpush3.bf16.msra.mxu0 %v2995_v53 }
 0x5d3   :  { %2631 = vmatprep.subr.bf16.mxu0 %v3116_v2 }
 0x5d6   :  { %2632 = vmatpush3.bf16.msra.mxu0 %v2996_v54 }
 0x5d7   :  { %2633 = vmatprep.subr.bf16.mxu0 %v3116_v2 }
 0x5da   :  { %2634 = vmatpush3.bf16.msra.mxu0 %v2997_v55 }
 0x690   :  { %v2526_v62 = vpop.f32.mrb[4].mxu0 }
 0x691   :  { %v2527_v0 = vpop.f32.mrb[5].mxu0 }
 0x692   :  { %v2528_v1 = vadd.f32 %v2527_v0, %v2526_v62  ;;  %v2529_v3 = vpop.f32.mrb[6].mxu0 }
 0x693   :  { %v2530_v6 = vpop.f32.mrb[7].mxu0 }
 0x694   :  { %v1889_v8 = vadd.f32 %v2528_v1, %v1757_v63  ;;  %v2531_v9 = vadd.f32 %v2530_v6, %v2529_v3 }
 0x696   :  { %v1892_v10 = vadd.f32 %v2531_v9, %v1757_v63  ;;  %v1895_v11 = vmax.f32 %v1889_v8, 0.0 }
 0x698   :  { %v1896_v12 = vmax.f32 %v1892_v10, 0.0 }
 0x69a   :  { %v1897_v13 = vpack.c.bf16 %v1896_v12, %v1895_v11 }
 0x69c   :  { %2636 = vmatmul.mubr.bf16.vlgmr.msra.gmra.mrb[8].mxu0 %v1897_v13 }
 0x76f   :  { %v1998_v17 = vpop.f32.mrb[8].mxu0 }
 0x770   :  { %v1999_v18 = vadd.f32 %v1998_v17, %v1915_v16  ;;  %v2637_v19 = vpop.f32.mrb[9].mxu0 }
 0x771   :  { %v2001_v20 = vpop.f32.mrb[10].mxu0 }
 0x772   :  { %v2002_v21 = vadd.f32 %v2001_v20, %v1915_v16  ;;  %v2638_v22 = vpop.f32.mrb[11].mxu0  ;;  %v2005_v23 = vmax.f32 %v1999_v18, 0.0 }
 0x774   :  { %v2006_v24 = vmax.f32 %v2002_v21, 0.0 }
 0x776   :  { %v2007_v26 = vpack.c.bf16 %v2006_v24, %v2005_v23 }
 0x778   :  { %2656 = vmatmul.mubr.bf16.vlgmr.msra.gmra.mrb[20].mxu1 %v2007_v26 }
 0x779   :  { %2660 = vmatpush3.bf16.msra.mxu1 %v3006_v25  ;;  %2675 = vmatprep.mubr.msk.bf16.mxu1 %vm3117_vm0, %v3116_v2 }
 0x77a   :  { %2661 = vmatprep.subr.bf16.mxu1 %v3116_v2 }
 0x77d   :  { %2662 = vmatpush3.bf16.msra.mxu1 %v3007_v27 }
 0x77e   :  { %2663 = vmatprep.subr.bf16.mxu1 %v3116_v2 }
 0x781   :  { %2664 = vmatpush3.bf16.msra.mxu1 %v3008_v28 }
 0x782   :  { %2665 = vmatprep.subr.bf16.mxu1 %v3116_v2 }
 0x785   :  { %2666 = vmatpush3.bf16.msra.mxu1 %v3009_v29 }
 0x786   :  { %2667 = vmatprep.subr.bf16.mxu1 %v3116_v2 }
 0x789   :  { %2668 = vmatpush3.bf16.msra.mxu1 %v3010_v30 }
 0x78a   :  { %2669 = vmatprep.subr.bf16.mxu1 %v3116_v2 }
 0x78d   :  { %2670 = vmatpush3.bf16.msra.mxu1 %v3011_v31 }
 0x78e   :  { %2671 = vmatprep.subr.bf16.mxu1 %v3116_v2 }
 0x791   :  { %2672 = vmatpush3.bf16.msra.mxu1 %v3012_v32 }
 0x792   :  { %2673 = vmatprep.subr.bf16.mxu1 %v3116_v2  ;;  %v1232_v2 = vld [vmem:[%s3382_s6 + $0x4] ss:$0 sm:$0xff] }
 0x793   :  { %v2683_v45 = vadd.f32 %v2135_v44, %v1232_v2 }
 0x795   :  { %2674 = vmatpush3.bf16.msra.mxu1 %v3013_v33 }
 0x84b   :  { %v2108_v35 = vpop.f32.mrb[20].mxu1 }
 0x84c   :  { %v2109_v36 = vadd.f32 %v2108_v35, %v2025_v34  ;;  %v2657_v37 = vpop.f32.mrb[21].mxu1 }
 0x84d   :  { %v2111_v38 = vpop.f32.mrb[22].mxu1 }
 0x84e   :  { %v2112_v39 = vadd.f32 %v2111_v38, %v2025_v34  ;;  %v2658_v40 = vpop.f32.mrb[23].mxu1  ;;  %v2115_v41 = vmax.f32 %v2109_v36, 0.0 }
 0x850   :  { %v2116_v42 = vmax.f32 %v2112_v39, 0.0 }
 0x852   :  { %v2117_v43 = vpack.c.bf16 %v2116_v42, %v2115_v41 }
 0x854   :  { %2676 = vmatmul.mubr.bf16.vlgmr.msra.gmra.mrb[12].mxu1 %v2117_v43 }
 0x927   :  { %v2218_v46 = vpop.f32.mrb[12].mxu1 }
 0x928   :  { %v2684_v47 = vadd.f32 %v2683_v45, %v2218_v46  ;;  %v2677_v48 = vpop.f32.mrb[13].mxu1 }
 0x929   :  { %v2221_v49 = vpop.f32.mrb[14].mxu1 }
 0x92a   :  { %2227 = vst [vmem:[%s3383_s7] sm:$0xff] %v2684_v47  ;;  %v2686_v50 = vadd.f32 %v2683_v45, %v2221_v49  ;;  %v2678_v51 = vpop.f32.mrb[15].mxu1 }
 0x92c   :  { %2228 = vst [vmem:[%s3383_s7 + $0x8] sm:$0xff] %v2686_v50 }
 0x92d   :  { %2233 = vsyncpa [#allocation3], 1 }
 0x92e   :  { %2234 = vsyncpa [#allocation5], 1 }
 0x92f   :  { %2235 = vsyncpa [#allocation8], 1 }

</bundles_post_ra>
